<compile_context>
chip_gen: v7x
topology: tpu7x:2x2x1
jax: 0.10.0
libtpu: 0.0.40
codegen_flags: <defaults>
</compile_context>

<pallas_src>
import math

import jax
import jax.numpy as jnp
from jax.experimental import pallas as pl
from jax.experimental.pallas import tpu as pltpu


# ----------------------------------------------------------------------------
# Faithful interface semantics (no compute — forward raises).
# ----------------------------------------------------------------------------
class LayerInterface:
    def forward(self, *args, **kwargs):
        error_msg = f"forward method not implemented in {self.__class__}"
        if len(args) > 0:
            error_msg += f"\n\targs: {args}"
        if len(kwargs) > 0:
            error_msg += f"\n\tkwargs: {kwargs}"
        raise NotImplementedError(error_msg)

    def __call__(self, *args, **kwargs):
        return self.forward(*args, **kwargs)


class BaseDecoderBlockInterface(LayerInterface):
    # TODO(synk): the base interface defines no computation (forward raises
    # NotImplementedError), so there is nothing to lower to Pallas for the base
    # class itself; the concrete decoder block below is its canonical instantiation.
    def forward(self, *args, **kwargs):
        super().forward(*args, **kwargs)


# ----------------------------------------------------------------------------
# Platform helpers
# ----------------------------------------------------------------------------
_VMEM_LIMIT = None


def _vmem_limit_bytes():
    """Explicit scoped-VMEM limit: ~7/8 of physical VMEM (v5e/v6e 128 MiB, v7x 64 MiB)."""
    global _VMEM_LIMIT
    if _VMEM_LIMIT is None:
        try:
            cap = int(pltpu.get_tpu_info().vmem_capacity_bytes)
        except Exception:
            cap = 64 * 1024 * 1024
        _VMEM_LIMIT = max(32 * 1024 * 1024, min((cap * 7) // 8, 128 * 1024 * 1024))
    return _VMEM_LIMIT


_BUFFERED_OK = None


def _buffered_ok():
    """Probe whether BlockSpec(pipeline_mode=pl.Buffered(1)) lowers on this JAX/TPU."""
    global _BUFFERED_OK
    if _BUFFERED_OK is None:
        try:
            def _probe(x_ref, o_ref):
                o_ref[...] = x_ref[...] + 1.0

            spec = pl.BlockSpec((8, 128), lambda i: (0, 0),
                                pipeline_mode=pl.Buffered(1))
            out = pl.pallas_call(
                _probe,
                out_shape=jax.ShapeDtypeStruct((8, 128), jnp.float32),
                grid=(1,),
                in_specs=[spec],
                out_specs=pl.BlockSpec((8, 128), lambda i: (0, 0)),
            )(jnp.zeros((8, 128), jnp.float32))
            jax.block_until_ready(out)
            _BUFFERED_OK = True
        except Exception:
            _BUFFERED_OK = False
    return _BUFFERED_OK


def _const_spec(block_shape, grid_ndim):
    """BlockSpec for grid-invariant blocks (weights / biases): constant index_map,
    single-buffered where supported (halves resident-weight VMEM footprint)."""
    zeros = (0,) * len(block_shape)
    index_map = {1: (lambda i: zeros), 2: (lambda i, j: zeros)}[grid_ndim]
    if _buffered_ok():
        return pl.BlockSpec(block_shape, index_map, pipeline_mode=pl.Buffered(1))
    return pl.BlockSpec(block_shape, index_map)


def _pick_tile(n, target):
    """Largest divisor of n that is a multiple of 8 and <= target (whole axis otherwise).
    Never falls back to tiny 8-row tiles."""
    if n <= target:
        return n
    for t in range(target, 7, -1):
        if n % t == 0 and t % 8 == 0:
            return t
    return n


# ----------------------------------------------------------------------------
# In-kernel helpers (only Python constants are closed over)
# ----------------------------------------------------------------------------
def _layernorm(x, g, b, eps=1e-5):
    mu = jnp.mean(x, axis=-1, keepdims=True)
    var = jnp.mean((x - mu) ** 2, axis=-1, keepdims=True)
    return (x - mu) * jax.lax.rsqrt(var + eps) * g + b


def _make_attn_kernel(d_model, n_heads, scale, kv_len, ln_source):
    """Fused pre-LN attention sublayer. Grid = (B, T//tq).

    ln_source=True : self-attention (K/V source = x, layer-normed with same params)
    ln_source=False: cross-attention (K/V source = raw encoder memory)
    K/V are projected only on the first Q tile of each batch element (pl.when) and
    kept in bf16 VMEM scratch for the remaining Q tiles.
    """
    H, dh = n_heads, d_model // n_heads

    def kernel(xq_ref, src_ref, g_ref, b_ref, wq_ref, bq_ref,
               wkv_ref, bkv_ref, wo_ref, bo_ref, m_ref, o_ref, k_scr, v_scr):
        # ---- K/V projection: once per batch element (first Q tile only) ----
        @pl.when(pl.program_id(1) == 0)
        def _():
            src = src_ref[0].astype(jnp.float32)                    # (S, D)
            if ln_source:
                src = _layernorm(src, g_ref[...], b_ref[...])
            kv = jnp.dot(src.astype(jnp.bfloat16), wkv_ref[...],
                         preferred_element_type=jnp.float32) + bkv_ref[...]
            k_scr[...] = kv[:, :d_model].astype(jnp.bfloat16)
            v_scr[...] = kv[:, d_model:].astype(jnp.bfloat16)

        # ---- Q projection for this query tile (K = D contraction) ----
        x = xq_ref[0].astype(jnp.float32)                           # (tq, D) residual input
        xn = _layernorm(x, g_ref[...], b_ref[...])
        q = jnp.dot(xn.astype(jnp.bfloat16), wq_ref[...],
                    preferred_element_type=jnp.float32) + bq_ref[...]
        q = q * scale                                               # scale folded in once
        tq = q.shape[0]

        # ---- head-batched attention: one batched matmul per stage, no per-head loop ----
        qh = q.reshape(tq, H, dh).astype(jnp.bfloat16)              # (tq, H, dh)
        kh = k_scr[...].reshape(kv_len, H, dh)                      # (S, H, dh) bf16
        vh = v_scr[...].reshape(kv_len, H, dh)                      # (S, H, dh) bf16

        s = jnp.einsum("qhd,khd->hqk", qh, kh,
                       preferred_element_type=jnp.float32)          # (H, tq, S) f32
        mask_f = (m_ref[...] > 0).astype(jnp.float32)               # (tq, S), built once
        s = s + ((mask_f - 1.0) * 1e9)[None, :, :]                  # additive mask, f32
        s = s - jnp.max(s, axis=-1, keepdims=True)
        p = jnp.exp(s) * mask_f[None, :, :]                         # zero fully-masked rows
        l = jnp.maximum(jnp.sum(p, axis=-1, keepdims=True), 1e-9)
        p = p * pl.reciprocal(l, approx=True)                       # EUP slot, ~free

        ctx = jnp.einsum("hqk,khd->qhd", p.astype(jnp.bfloat16), vh,
                         preferred_element_type=jnp.float32)        # (tq, H, dh)

        # ---- single K = D output projection + residual ----
        out = jnp.dot(ctx.reshape(tq, d_model).astype(jnp.bfloat16), wo_ref[...],
                      preferred_element_type=jnp.float32) + bo_ref[...]
        o_ref[0] = (x + out).astype(o_ref.dtype)                    # lane-dense (tq, D) store

    return kernel


def _ffn_kernel(x_ref, g_ref, b_ref, w1_ref, b1_ref, w2_ref, b2_ref, o_ref):
    x = x_ref[...].astype(jnp.float32)                              # (tm, D)
    xn = _layernorm(x, g_ref[...], b_ref[...])
    h = jnp.dot(xn.astype(jnp.bfloat16), w1_ref[...],
                preferred_element_type=jnp.float32) + b1_ref[...]
    h = jnp.maximum(h, 0.0)
    y = jnp.dot(h.astype(jnp.bfloat16), w2_ref[...],
                preferred_element_type=jnp.float32) + b2_ref[...]
    o_ref[...] = (x + y).astype(o_ref.dtype)


# ----------------------------------------------------------------------------
# pallas_call wrappers
# ----------------------------------------------------------------------------
def fused_attention(x, source, mask_i32, ln_g, ln_b,
                    w_q, b_q, w_kv, b_kv, w_o, b_o, n_heads,
                    *, ln_source, q_tile=256):
    B, T, D = x.shape
    S = source.shape[1]
    tq = _pick_tile(T, q_tile)
    scale = 1.0 / math.sqrt(D // n_heads)        # Python float -> compile-time constant
    kernel = _make_attn_kernel(D, n_heads, scale, S, ln_source)
    return pl.pallas_call(
        kernel,
        out_shape=jax.ShapeDtypeStruct((B, T, D), x.dtype),
        grid=(B, T // tq),
        in_specs=[
            pl.BlockSpec((1, tq, D), lambda b, q: (b, q, 0)),   # x query tile
            pl.BlockSpec((1, S, D), lambda b, q: (b, 0, 0)),    # K/V source (resident per b)
            _const_spec((1, D), 2),                             # ln gamma
            _const_spec((1, D), 2),                             # ln beta
            _const_spec((D, D), 2),                             # Wq       (bf16, resident)
            _const_spec((1, D), 2),                             # bq
            _const_spec((D, 2 * D), 2),                         # fused Wkv (bf16, resident)
            _const_spec((1, 2 * D), 2),                         # bkv
            _const_spec((D, D), 2),                             # Wo       (bf16, resident)
            _const_spec((1, D), 2),                             # bo
            pl.BlockSpec((tq, S), lambda b, q: (q, 0)),         # shared 2D mask tile
        ],
        out_specs=pl.BlockSpec((1, tq, D), lambda b, q: (b, q, 0)),
        scratch_shapes=[pltpu.VMEM((S, D), jnp.bfloat16),       # K (persists across Q tiles)
                        pltpu.VMEM((S, D), jnp.bfloat16)],      # V
        compiler_params=pltpu.CompilerParams(
            dimension_semantics=("parallel", "arbitrary"),
            vmem_limit_bytes=_vmem_limit_bytes()),
    )(x, source, ln_g, ln_b, w_q, b_q, w_kv, b_kv, w_o, b_o, mask_i32)


def fused_ffn(x2d, ln_g, ln_b, w1, b1, w2, b2, tile_m=512):
    M, D = x2d.shape
    F = w1.shape[1]
    tm = _pick_tile(M, tile_m)
    return pl.pallas_call(
        _ffn_kernel,
        out_shape=jax.ShapeDtypeStruct((M, D), x2d.dtype),
        grid=(M // tm,),
        in_specs=[
            pl.BlockSpec((tm, D), lambda i: (i, 0)),            # streamed activations
            _const_spec((1, D), 1),
            _const_spec((1, D), 1),
            _const_spec((D, F), 1),                             # W1 (bf16, resident)
            _const_spec((1, F), 1),
            _const_spec((F, D), 1),                             # W2 (bf16, resident)
            _const_spec((1, D), 1),
        ],
        out_specs=pl.BlockSpec((tm, D), lambda i: (i, 0)),
        compiler_params=pltpu.CompilerParams(
            dimension_semantics=("parallel",),
            vmem_limit_bytes=_vmem_limit_bytes()),
    )(x2d, ln_g, ln_b, w1, b1, w2, b2)


# ----------------------------------------------------------------------------
# Concrete decoder block built on the fused Pallas kernels
# ----------------------------------------------------------------------------
class PallasDecoderBlock(BaseDecoderBlockInterface):
    """Pre-LN decoder block: self-attn -> cross-attn -> FFN, residuals (all Pallas)."""

    def __init__(self, d_model=32, n_heads=4, d_ff=64, key=None):
        self.d_model = d_model
        self.n_heads = n_heads
        self.d_head = d_model // n_heads
        self.d_ff = d_ff
        key = jax.random.PRNGKey(0) if key is None else key
        ks = jax.random.split(key, 16)
        dm, df = d_model, d_ff
        sc = 1.0 / math.sqrt(dm)

        def lin(k, i, o):
            # Weights stored in bf16 (MXU-native inputs, half the VMEM footprint).
            return (jax.random.normal(k, (i, o), jnp.float32) * sc).astype(jnp.bfloat16)

        # self-attention: Wq [D,D] + fused Wkv [D,2D]
        self.sa_wq = lin(ks[0], dm, dm)
        self.sa_bq = jnp.zeros((1, dm), jnp.float32)
        self.sa_wkv = jnp.concatenate([lin(ks[1], dm, dm), lin(ks[2], dm, dm)], axis=1)
        self.sa_bkv = jnp.zeros((1, 2 * dm), jnp.float32)
        self.sa_wo = lin(ks[3], dm, dm)
        self.sa_bo = jnp.zeros((1, dm), jnp.float32)
        # cross-attention: Q from x, fused KV [D,2D] from encoder memory
        self.ca_wq = lin(ks[4], dm, dm)
        self.ca_bq = jnp.zeros((1, dm), jnp.float32)
        self.ca_wkv = jnp.concatenate([lin(ks[5], dm, dm), lin(ks[6], dm, dm)], axis=1)
        self.ca_bkv = jnp.zeros((1, 2 * dm), jnp.float32)
        self.ca_wo = lin(ks[7], dm, dm)
        self.ca_bo = jnp.zeros((1, dm), jnp.float32)
        # feed-forward
        self.ff_w1, self.ff_w2 = lin(ks[8], dm, df), lin(ks[9], df, dm)
        self.ff_b1 = jnp.zeros((1, df), jnp.float32)
        self.ff_b2 = jnp.zeros((1, dm), jnp.float32)
        # layernorms (f32)
        one = jnp.ones((1, dm), jnp.float32)
        zero = jnp.zeros((1, dm), jnp.float32)
        self.ln1_g, self.ln1_b = one, zero
        self.ln2_g, self.ln2_b = one, zero
        self.ln3_g, self.ln3_b = one, zero

    def forward(self, x, tgt_mask, memory, memory_mask):
        B, T, D = x.shape
        tgt_m = tgt_mask.astype(jnp.int32)        # compact shared mask, no per-head broadcast
        mem_m = memory_mask.astype(jnp.int32)
        # self-attention sublayer (fused kernel, K/V source = x, residual inside)
        x = fused_attention(x, x, tgt_m, self.ln1_g, self.ln1_b,
                            self.sa_wq, self.sa_bq, self.sa_wkv, self.sa_bkv,
                            self.sa_wo, self.sa_bo, self.n_heads, ln_source=True)
        # cross-attention to encoder memory (fused kernel, residual inside)
        x = fused_attention(x, memory, mem_m, self.ln2_g, self.ln2_b,
                            self.ca_wq, self.ca_bq, self.ca_wkv, self.ca_bkv,
                            self.ca_wo, self.ca_bo, self.n_heads, ln_source=False)
        # feed-forward sublayer (fused kernel, M-tiled, residual inside)
        x = fused_ffn(x.reshape(B * T, D), self.ln3_g, self.ln3_b,
                      self.ff_w1, self.ff_b1, self.ff_w2, self.ff_b2).reshape(B, T, D)
        # DecoderBlockResult-style return
        return x, tgt_mask, memory, memory_mask

    # TODO(synk): optional further fusion of all three sublayers into one pallas_call
    # (saves activation HBM round-trips on v5e/v6e) is left out to stay within v7x's
    # 64 MiB VMEM without extra tuning.


# ----------------------------------------------------------------------------
if __name__ == "__main__":
    # 1) Faithful interface semantics: the base class forward must raise.
    base = BaseDecoderBlockInterface()
    try:
        base.forward(jnp.zeros((1,)))
        raise AssertionError("BaseDecoderBlockInterface.forward should raise")
    except NotImplementedError:
        pass

    # 2) Run the Pallas-backed concrete decoder block.
    B, T, S, D, H, F = 2, 8, 8, 32, 4, 64
    key = jax.random.PRNGKey(0)
    kx, km, kp = jax.random.split(key, 3)
    x = jax.random.normal(kx, (B, T, D), jnp.float32)
    memory = jax.random.normal(km, (B, S, D), jnp.float32)
    tgt_mask = jnp.tril(jnp.ones((T, T), jnp.float32))     # causal
    memory_mask = jnp.ones((T, S), jnp.float32)            # full visibility

    block = PallasDecoderBlock(d_model=D, n_heads=H, d_ff=F, key=kp)
    out, _, _, _ = block(x, tgt_mask, memory, memory_mask)
    out = jax.block_until_ready(out)
    assert out.shape == (B, T, D) and out.dtype == jnp.float32
    assert bool(jnp.all(jnp.isfinite(out)))
    print("KERNEL_OK")
</pallas_src>

<mosaic_0001>
module attributes {stable_mosaic.version = 11 : i64} {
  func.func @_probe(%arg0: i32, %arg1: memref<8x128xf32, #tpu.memory_space<vmem>>, %arg2: memref<8x128xf32, #tpu.memory_space<vmem>>) attributes {dimension_semantics = [#tpu.dimension_semantics<arbitrary>], iteration_bounds = array<i64: 1>, scalar_prefetch = 0 : i64, scratch_operands = 0 : i64, tpu.core_type = #tpu.core_type<tc>, window_params = [{pipeline_mode = #tpu.pipeline_mode<synchronous>, transform_indices = @transform_0, window_bounds = array<i64: 8, 128>}, {pipeline_mode = #tpu.pipeline_mode<synchronous>, transform_indices = @transform_1, window_bounds = array<i64: 8, 128>}]} {
    %c0 = arith.constant 0 : index
    %c0_0 = arith.constant 0 : index
    %0 = vector.load %arg1[%c0, %c0_0] : memref<8x128xf32, #tpu.memory_space<vmem>>, vector<8x128xf32>
    %cst = arith.constant 1.000000e+00 : f32
    %1 = vector.broadcast %cst : f32 to vector<8x128xf32>
    %2 = arith.addf %0, %1 : vector<8x128xf32>
    %c0_1 = arith.constant 0 : index
    %c0_2 = arith.constant 0 : index
    %3 = vector.load %arg2[%c0_1, %c0_2] : memref<8x128xf32, #tpu.memory_space<vmem>>, vector<8x128xf32>
    tpu.vector_store %arg2[%c0_1, %c0_2], %2 {strides = array<i32>} : memref<8x128xf32, #tpu.memory_space<vmem>>, vector<8x128xf32>,
    return
  }
  func.func @transform_0(%arg0: i32) -> (i32, i32) {
    %c0_i32 = arith.constant 0 : i32
    %c0_i32_0 = arith.constant 0 : i32
    %c0_i32_1 = arith.constant 0 : i32
    return %c0_i32, %c0_i32_0 : i32, i32
  }
  func.func @transform_1(%arg0: i32) -> (i32, i32) {
    %c0_i32 = arith.constant 0 : i32
    %c0_i32_0 = arith.constant 0 : i32
    %c0_i32_1 = arith.constant 0 : i32
    return %c0_i32, %c0_i32_0 : i32, i32
  }
}

module attributes {stable_mosaic.version = 11 : i64} {
  func.func @kernel(%arg0: i32, %arg1: i32, %arg2: memref<1x8x32xf32, #tpu.memory_space<vmem>>, %arg3: memref<1x8x32xf32, #tpu.memory_space<vmem>>, %arg4: memref<1x32xf32, #tpu.memory_space<vmem>>, %arg5: memref<1x32xf32, #tpu.memory_space<vmem>>, %arg6: memref<32x32xbf16, #tpu.memory_space<vmem>>, %arg7: memref<1x32xf32, #tpu.memory_space<vmem>>, %arg8: memref<32x64xbf16, #tpu.memory_space<vmem>>, %arg9: memref<1x64xf32, #tpu.memory_space<vmem>>, %arg10: memref<32x32xbf16, #tpu.memory_space<vmem>>, %arg11: memref<1x32xf32, #tpu.memory_space<vmem>>, %arg12: memref<8x8xi32, #tpu.memory_space<vmem>>, %arg13: memref<1x8x32xf32, #tpu.memory_space<vmem>>, %arg14: memref<8x32xbf16, #tpu.memory_space<vmem>>, %arg15: memref<8x32xbf16, #tpu.memory_space<vmem>>) attributes {dimension_semantics = [#tpu.dimension_semantics<parallel>, #tpu.dimension_semantics<arbitrary>], iteration_bounds = array<i64: 2, 1>, scalar_prefetch = 0 : i64, scratch_operands = 2 : i64, tpu.core_type = #tpu.core_type<tc>, window_params = [{transform_indices = @transform_0, window_bounds = array<i64: 1, 8, 32>}, {transform_indices = @transform_1, window_bounds = array<i64: 1, 8, 32>}, {pipeline_mode = #tpu.pipeline_mode<synchronous>, transform_indices = @transform_2, window_bounds = array<i64: 1, 32>}, {pipeline_mode = #tpu.pipeline_mode<synchronous>, transform_indices = @transform_3, window_bounds = array<i64: 1, 32>}, {pipeline_mode = #tpu.pipeline_mode<synchronous>, transform_indices = @transform_4, window_bounds = array<i64: 32, 32>}, {pipeline_mode = #tpu.pipeline_mode<synchronous>, transform_indices = @transform_5, window_bounds = array<i64: 1, 32>}, {pipeline_mode = #tpu.pipeline_mode<synchronous>, transform_indices = @transform_6, window_bounds = array<i64: 32, 64>}, {pipeline_mode = #tpu.pipeline_mode<synchronous>, transform_indices = @transform_7, window_bounds = array<i64: 1, 64>}, {pipeline_mode = #tpu.pipeline_mode<synchronous>, transform_indices = @transform_8, window_bounds = array<i64: 32, 32>}, {pipeline_mode = #tpu.pipeline_mode<synchronous>, transform_indices = @transform_9, window_bounds = array<i64: 1, 32>}, {transform_indices = @transform_10, window_bounds = array<i64: 8, 8>}, {transform_indices = @transform_11, window_bounds = array<i64: 1, 8, 32>}]} {
    %c0_i32 = arith.constant 0 : i32
    %0 = arith.cmpi eq, %arg1, %c0_i32 : i32
    %1 = arith.extui %0 : i1 to i32
    %c0_i32_0 = arith.constant 0 : i32
    %2 = arith.cmpi ne, %1, %c0_i32_0 : i32
    scf.if %2 {
      %c0_39 = arith.constant 0 : index
      %c0_40 = arith.constant 0 : index
      %c0_41 = arith.constant 0 : index
      %85 = vector.load %arg3[%c0_39, %c0_40, %c0_41] : memref<1x8x32xf32, #tpu.memory_space<vmem>>, vector<1x8x32xf32>
      %86 = vector.shape_cast %85 : vector<1x8x32xf32> to vector<8x32xf32>
      %c0_42 = arith.constant 0 : index
      %c0_43 = arith.constant 0 : index
      %87 = vector.load %arg4[%c0_42, %c0_43] : memref<1x32xf32, #tpu.memory_space<vmem>>, vector<1x32xf32>
      %c0_44 = arith.constant 0 : index
      %c0_45 = arith.constant 0 : index
      %88 = vector.load %arg5[%c0_44, %c0_45] : memref<1x32xf32, #tpu.memory_space<vmem>>, vector<1x32xf32>
      %cst_46 = arith.constant dense<0.000000e+00> : vector<8xf32>
      %89 = vector.multi_reduction <add>, %86, %cst_46 [1] : vector<8x32xf32> to vector<8xf32>
      %90 = vector.shape_cast %89 : vector<8xf32> to vector<8x1xf32>
      %cst_47 = arith.constant 3.200000e+01 : f32
      %91 = vector.broadcast %cst_47 : f32 to vector<8x1xf32>
      %92 = arith.divf %90, %91 : vector<8x1xf32>
      %93 = vector.broadcast %92 : vector<8x1xf32> to vector<8x32xf32>
      %94 = arith.subf %86, %93 : vector<8x32xf32>
      %95 = arith.mulf %94, %94 : vector<8x32xf32>
      %cst_48 = arith.constant dense<0.000000e+00> : vector<8xf32>
      %96 = vector.multi_reduction <add>, %95, %cst_48 [1] : vector<8x32xf32> to vector<8xf32>
      %97 = vector.shape_cast %96 : vector<8xf32> to vector<8x1xf32>
      %cst_49 = arith.constant 3.200000e+01 : f32
      %98 = vector.broadcast %cst_49 : f32 to vector<8x1xf32>
      %99 = arith.divf %97, %98 : vector<8x1xf32>
      %100 = vector.broadcast %92 : vector<8x1xf32> to vector<8x32xf32>
      %101 = arith.subf %86, %100 : vector<8x32xf32>
      %cst_50 = arith.constant 9.99999974E-6 : f32
      %102 = vector.broadcast %cst_50 : f32 to vector<8x1xf32>
      %103 = arith.addf %99, %102 : vector<8x1xf32>
      %104 = math.rsqrt %103 : vector<8x1xf32>
      %105 = vector.broadcast %104 : vector<8x1xf32> to vector<8x32xf32>
      %106 = arith.mulf %101, %105 : vector<8x32xf32>
      %107 = vector.broadcast %87 : vector<1x32xf32> to vector<8x32xf32>
      %108 = arith.mulf %106, %107 : vector<8x32xf32>
      %109 = vector.broadcast %88 : vector<1x32xf32> to vector<8x32xf32>
      %110 = arith.addf %108, %109 : vector<8x32xf32>
      %111 = arith.truncf %110 : vector<8x32xf32> to vector<8x32xbf16>
      %c0_51 = arith.constant 0 : index
      %c0_52 = arith.constant 0 : index
      %112 = vector.load %arg8[%c0_51, %c0_52] : memref<32x64xbf16, #tpu.memory_space<vmem>>, vector<32x64xbf16>
      %cst_53 = arith.constant dense<0.000000e+00> : vector<8x64xf32>
      %113 = tpu.matmul %111, %112, %cst_53 {dimension_numbers = #tpu.dot_dimension_numbers<[1], [0], [0], [1], [0, 0, 1, 1], [], []>} : vector<8x32xbf16>, vector<32x64xbf16>, vector<8x64xf32> -> vector<8x64xf32>
      %c0_54 = arith.constant 0 : index
      %c0_55 = arith.constant 0 : index
      %114 = vector.load %arg9[%c0_54, %c0_55] : memref<1x64xf32, #tpu.memory_space<vmem>>, vector<1x64xf32>
      %115 = vector.broadcast %114 : vector<1x64xf32> to vector<8x64xf32>
      %116 = arith.addf %113, %115 : vector<8x64xf32>
      %117 = vector.extract_strided_slice %116 {offsets = [0, 0], sizes = [8, 32], strides = [1, 1]} : vector<8x64xf32> to vector<8x32xf32>
      %118 = arith.truncf %117 : vector<8x32xf32> to vector<8x32xbf16>
      %c0_56 = arith.constant 0 : index
      %c0_57 = arith.constant 0 : index
      %119 = vector.load %arg14[%c0_56, %c0_57] : memref<8x32xbf16, #tpu.memory_space<vmem>>, vector<8x32xbf16>
      tpu.vector_store %arg14[%c0_56, %c0_57], %118 {strides = array<i32>} : memref<8x32xbf16, #tpu.memory_space<vmem>>, vector<8x32xbf16>,
      %120 = vector.extract_strided_slice %116 {offsets = [0, 32], sizes = [8, 32], strides = [1, 1]} : vector<8x64xf32> to vector<8x32xf32>
      %121 = arith.truncf %120 : vector<8x32xf32> to vector<8x32xbf16>
      %c0_58 = arith.constant 0 : index
      %c0_59 = arith.constant 0 : index
      %122 = vector.load %arg15[%c0_58, %c0_59] : memref<8x32xbf16, #tpu.memory_space<vmem>>, vector<8x32xbf16>
      tpu.vector_store %arg15[%c0_58, %c0_59], %121 {strides = array<i32>} : memref<8x32xbf16, #tpu.memory_space<vmem>>, vector<8x32xbf16>,
    } else {
    }
    %c0 = arith.constant 0 : index
    %c0_1 = arith.constant 0 : index
    %c0_2 = arith.constant 0 : index
    %3 = vector.load %arg2[%c0, %c0_1, %c0_2] : memref<1x8x32xf32, #tpu.memory_space<vmem>>, vector<1x8x32xf32>
    %4 = vector.shape_cast %3 : vector<1x8x32xf32> to vector<8x32xf32>
    %c0_3 = arith.constant 0 : index
    %c0_4 = arith.constant 0 : index
    %5 = vector.load %arg4[%c0_3, %c0_4] : memref<1x32xf32, #tpu.memory_space<vmem>>, vector<1x32xf32>
    %c0_5 = arith.constant 0 : index
    %c0_6 = arith.constant 0 : index
    %6 = vector.load %arg5[%c0_5, %c0_6] : memref<1x32xf32, #tpu.memory_space<vmem>>, vector<1x32xf32>
    %cst = arith.constant dense<0.000000e+00> : vector<8xf32>
    %7 = vector.multi_reduction <add>, %4, %cst [1] : vector<8x32xf32> to vector<8xf32>
    %8 = vector.shape_cast %7 : vector<8xf32> to vector<8x1xf32>
    %cst_7 = arith.constant 3.200000e+01 : f32
    %9 = vector.broadcast %cst_7 : f32 to vector<8x1xf32>
    %10 = arith.divf %8, %9 : vector<8x1xf32>
    %11 = vector.broadcast %10 : vector<8x1xf32> to vector<8x32xf32>
    %12 = arith.subf %4, %11 : vector<8x32xf32>
    %13 = arith.mulf %12, %12 : vector<8x32xf32>
    %cst_8 = arith.constant dense<0.000000e+00> : vector<8xf32>
    %14 = vector.multi_reduction <add>, %13, %cst_8 [1] : vector<8x32xf32> to vector<8xf32>
    %15 = vector.shape_cast %14 : vector<8xf32> to vector<8x1xf32>
    %cst_9 = arith.constant 3.200000e+01 : f32
    %16 = vector.broadcast %cst_9 : f32 to vector<8x1xf32>
    %17 = arith.divf %15, %16 : vector<8x1xf32>
    %18 = vector.broadcast %10 : vector<8x1xf32> to vector<8x32xf32>
    %19 = arith.subf %4, %18 : vector<8x32xf32>
    %cst_10 = arith.constant 9.99999974E-6 : f32
    %20 = vector.broadcast %cst_10 : f32 to vector<8x1xf32>
    %21 = arith.addf %17, %20 : vector<8x1xf32>
    %22 = math.rsqrt %21 : vector<8x1xf32>
    %23 = vector.broadcast %22 : vector<8x1xf32> to vector<8x32xf32>
    %24 = arith.mulf %19, %23 : vector<8x32xf32>
    %25 = vector.broadcast %5 : vector<1x32xf32> to vector<8x32xf32>
    %26 = arith.mulf %24, %25 : vector<8x32xf32>
    %27 = vector.broadcast %6 : vector<1x32xf32> to vector<8x32xf32>
    %28 = arith.addf %26, %27 : vector<8x32xf32>
    %29 = arith.truncf %28 : vector<8x32xf32> to vector<8x32xbf16>
    %c0_11 = arith.constant 0 : index
    %c0_12 = arith.constant 0 : index
    %30 = vector.load %arg6[%c0_11, %c0_12] : memref<32x32xbf16, #tpu.memory_space<vmem>>, vector<32x32xbf16>
    %cst_13 = arith.constant dense<0.000000e+00> : vector<8x32xf32>
    %31 = tpu.matmul %29, %30, %cst_13 {dimension_numbers = #tpu.dot_dimension_numbers<[1], [0], [0], [1], [0, 0, 1, 1], [], []>} : vector<8x32xbf16>, vector<32x32xbf16>, vector<8x32xf32> -> vector<8x32xf32>
    %c0_14 = arith.constant 0 : index
    %c0_15 = arith.constant 0 : index
    %32 = vector.load %arg7[%c0_14, %c0_15] : memref<1x32xf32, #tpu.memory_space<vmem>>, vector<1x32xf32>
    %33 = vector.broadcast %32 : vector<1x32xf32> to vector<8x32xf32>
    %34 = arith.addf %31, %33 : vector<8x32xf32>
    %cst_16 = arith.constant 0.353553385 : f32
    %35 = vector.broadcast %cst_16 : f32 to vector<8x32xf32>
    %36 = arith.mulf %34, %35 : vector<8x32xf32>
    %37 = vector.shape_cast %36 : vector<8x32xf32> to vector<8x4x8xf32>
    %38 = arith.truncf %37 : vector<8x4x8xf32> to vector<8x4x8xbf16>
    %c0_17 = arith.constant 0 : index
    %c0_18 = arith.constant 0 : index
    %39 = vector.load %arg14[%c0_17, %c0_18] : memref<8x32xbf16, #tpu.memory_space<vmem>>, vector<8x32xbf16>
    %40 = vector.shape_cast %39 : vector<8x32xbf16> to vector<8x4x8xbf16>
    %c0_19 = arith.constant 0 : index
    %c0_20 = arith.constant 0 : index
    %41 = vector.load %arg15[%c0_19, %c0_20] : memref<8x32xbf16, #tpu.memory_space<vmem>>, vector<8x32xbf16>
    %42 = vector.shape_cast %41 : vector<8x32xbf16> to vector<8x4x8xbf16>
    "tpu.trace_start"() <{level = 10 : i32, message = "qhd,khd->hqk"}> : () -> ()
    %cst_21 = arith.constant dense<0.000000e+00> : vector<4x8x8xf32>
    %43 = tpu.matmul %38, %40, %cst_21 {dimension_numbers = #tpu.dot_dimension_numbers<[2], [2], [0], [0], [0, 1, 0, 0, 1, 0], [1], [1]>} : vector<8x4x8xbf16>, vector<8x4x8xbf16>, vector<4x8x8xf32> -> vector<4x8x8xf32>
    "tpu.trace_stop"() : () -> ()
    %c0_22 = arith.constant 0 : index
    %c0_23 = arith.constant 0 : index
    %44 = vector.load %arg12[%c0_22, %c0_23] : memref<8x8xi32, #tpu.memory_space<vmem>>, vector<8x8xi32>
    %c0_i32_24 = arith.constant 0 : i32
    %45 = vector.broadcast %c0_i32_24 : i32 to vector<8x8xi32>
    %46 = arith.cmpi sgt, %44, %45 : vector<8x8xi32>
    %47 = arith.extui %46 : vector<8x8xi1> to vector<8x8xi32>
    %48 = arith.sitofp %47 : vector<8x8xi32> to vector<8x8xf32>
    %cst_25 = arith.constant 1.000000e+00 : f32
    %49 = vector.broadcast %cst_25 : f32 to vector<8x8xf32>
    %50 = arith.subf %48, %49 : vector<8x8xf32>
    %cst_26 = arith.constant 1.000000e+09 : f32
    %51 = vector.broadcast %cst_26 : f32 to vector<8x8xf32>
    %52 = arith.mulf %50, %51 : vector<8x8xf32>
    %53 = vector.shape_cast %52 : vector<8x8xf32> to vector<1x8x8xf32>
    %54 = vector.broadcast %53 : vector<1x8x8xf32> to vector<4x8x8xf32>
    %55 = arith.addf %43, %54 : vector<4x8x8xf32>
    %cst_27 = arith.constant dense<0xFF800000> : vector<4x8xf32>
    %56 = vector.multi_reduction <maximumf>, %55, %cst_27 [2] : vector<4x8x8xf32> to vector<4x8xf32>
    %57 = vector.shape_cast %56 : vector<4x8xf32> to vector<4x8x1xf32>
    %58 = vector.broadcast %57 : vector<4x8x1xf32> to vector<4x8x8xf32>
    %59 = arith.subf %55, %58 : vector<4x8x8xf32>
    %60 = math.exp %59 : vector<4x8x8xf32>
    %61 = vector.shape_cast %48 : vector<8x8xf32> to vector<1x8x8xf32>
    %62 = vector.broadcast %61 : vector<1x8x8xf32> to vector<4x8x8xf32>
    %63 = arith.mulf %60, %62 : vector<4x8x8xf32>
    %cst_28 = arith.constant dense<0.000000e+00> : vector<4x8xf32>
    %64 = vector.multi_reduction <add>, %63, %cst_28 [2] : vector<4x8x8xf32> to vector<4x8xf32>
    %65 = vector.shape_cast %64 : vector<4x8xf32> to vector<4x8x1xf32>
    %cst_29 = arith.constant 9.99999971E-10 : f32
    %66 = vector.broadcast %cst_29 : f32 to vector<4x8x1xf32>
    %67 = arith.maximumf %65, %66 : vector<4x8x1xf32>
    %68 = tpu.reciprocal %67 {approx = true} : vector<4x8x1xf32> -> vector<4x8x1xf32>
    %69 = vector.broadcast %68 : vector<4x8x1xf32> to vector<4x8x8xf32>
    %70 = arith.mulf %63, %69 : vector<4x8x8xf32>
    %71 = arith.truncf %70 : vector<4x8x8xf32> to vector<4x8x8xbf16>
    "tpu.trace_start"() <{level = 10 : i32, message = "hqk,khd->qhd"}> : () -> ()
    %cst_30 = arith.constant dense<0.000000e+00> : vector<4x8x8xf32>
    %72 = tpu.matmul %42, %71, %cst_30 {dimension_numbers = #tpu.dot_dimension_numbers<[0], [2], [2], [1], [0, 1, 0, 2, 1, 1], [1], [0]>} : vector<8x4x8xbf16>, vector<4x8x8xbf16>, vector<4x8x8xf32> -> vector<4x8x8xf32>
    %73 = tpu.transpose %72, [2, 0, 1] : vector<4x8x8xf32> -> vector<8x4x8xf32>
    "tpu.trace_stop"() : () -> ()
    %74 = vector.shape_cast %73 : vector<8x4x8xf32> to vector<8x32xf32>
    %75 = arith.truncf %74 : vector<8x32xf32> to vector<8x32xbf16>
    %c0_31 = arith.constant 0 : index
    %c0_32 = arith.constant 0 : index
    %76 = vector.load %arg10[%c0_31, %c0_32] : memref<32x32xbf16, #tpu.memory_space<vmem>>, vector<32x32xbf16>
    %cst_33 = arith.constant dense<0.000000e+00> : vector<8x32xf32>
    %77 = tpu.matmul %75, %76, %cst_33 {dimension_numbers = #tpu.dot_dimension_numbers<[1], [0], [0], [1], [0, 0, 1, 1], [], []>} : vector<8x32xbf16>, vector<32x32xbf16>, vector<8x32xf32> -> vector<8x32xf32>
    %c0_34 = arith.constant 0 : index
    %c0_35 = arith.constant 0 : index
    %78 = vector.load %arg11[%c0_34, %c0_35] : memref<1x32xf32, #tpu.memory_space<vmem>>, vector<1x32xf32>
    %79 = vector.broadcast %78 : vector<1x32xf32> to vector<8x32xf32>
    %80 = arith.addf %77, %79 : vector<8x32xf32>
    %81 = arith.addf %4, %80 : vector<8x32xf32>
    %c0_36 = arith.constant 0 : index
    %c0_37 = arith.constant 0 : index
    %c0_38 = arith.constant 0 : index
    %82 = vector.load %arg13[%c0_36, %c0_37, %c0_38] : memref<1x8x32xf32, #tpu.memory_space<vmem>>, vector<1x8x32xf32>
    %83 = vector.shape_cast %82 : vector<1x8x32xf32> to vector<8x32xf32>
    %84 = vector.shape_cast %81 : vector<8x32xf32> to vector<1x8x32xf32>
    tpu.vector_store %arg13[%c0_36, %c0_37, %c0_38], %84 {strides = array<i32>} : memref<1x8x32xf32, #tpu.memory_space<vmem>>, vector<1x8x32xf32>,
    return
  }
  func.func @transform_0(%arg0: i32, %arg1: i32) -> (i32, i32, i32) {
    %c0_i32 = arith.constant 0 : i32
    %c0_i32_0 = arith.constant 0 : i32
    return %arg0, %arg1, %c0_i32 : i32, i32, i32
  }
  func.func @transform_1(%arg0: i32, %arg1: i32) -> (i32, i32, i32) {
    %c0_i32 = arith.constant 0 : i32
    %c0_i32_0 = arith.constant 0 : i32
    %c0_i32_1 = arith.constant 0 : i32
    return %arg0, %c0_i32, %c0_i32_0 : i32, i32, i32
  }
  func.func @transform_2(%arg0: i32, %arg1: i32) -> (i32, i32) {
    %c0_i32 = arith.constant 0 : i32
    %c0_i32_0 = arith.constant 0 : i32
    %c0_i32_1 = arith.constant 0 : i32
    return %c0_i32, %c0_i32_0 : i32, i32
  }
  func.func @transform_3(%arg0: i32, %arg1: i32) -> (i32, i32) {
    %c0_i32 = arith.constant 0 : i32
    %c0_i32_0 = arith.constant 0 : i32
    %c0_i32_1 = arith.constant 0 : i32
    return %c0_i32, %c0_i32_0 : i32, i32
  }
  func.func @transform_4(%arg0: i32, %arg1: i32) -> (i32, i32) {
    %c0_i32 = arith.constant 0 : i32
    %c0_i32_0 = arith.constant 0 : i32
    %c0_i32_1 = arith.constant 0 : i32
    return %c0_i32, %c0_i32_0 : i32, i32
  }
  func.func @transform_5(%arg0: i32, %arg1: i32) -> (i32, i32) {
    %c0_i32 = arith.constant 0 : i32
    %c0_i32_0 = arith.constant 0 : i32
    %c0_i32_1 = arith.constant 0 : i32
    return %c0_i32, %c0_i32_0 : i32, i32
  }
  func.func @transform_6(%arg0: i32, %arg1: i32) -> (i32, i32) {
    %c0_i32 = arith.constant 0 : i32
    %c0_i32_0 = arith.constant 0 : i32
    %c0_i32_1 = arith.constant 0 : i32
    return %c0_i32, %c0_i32_0 : i32, i32
  }
  func.func @transform_7(%arg0: i32, %arg1: i32) -> (i32, i32) {
    %c0_i32 = arith.constant 0 : i32
    %c0_i32_0 = arith.constant 0 : i32
    %c0_i32_1 = arith.constant 0 : i32
    return %c0_i32, %c0_i32_0 : i32, i32
  }
  func.func @transform_8(%arg0: i32, %arg1: i32) -> (i32, i32) {
    %c0_i32 = arith.constant 0 : i32
    %c0_i32_0 = arith.constant 0 : i32
    %c0_i32_1 = arith.constant 0 : i32
    return %c0_i32, %c0_i32_0 : i32, i32
  }
  func.func @transform_9(%arg0: i32, %arg1: i32) -> (i32, i32) {
    %c0_i32 = arith.constant 0 : i32
    %c0_i32_0 = arith.constant 0 : i32
    %c0_i32_1 = arith.constant 0 : i32
    return %c0_i32, %c0_i32_0 : i32, i32
  }
  func.func @transform_10(%arg0: i32, %arg1: i32) -> (i32, i32) {
    %c0_i32 = arith.constant 0 : i32
    %c0_i32_0 = arith.constant 0 : i32
    return %arg1, %c0_i32 : i32, i32
  }
  func.func @transform_11(%arg0: i32, %arg1: i32) -> (i32, i32, i32) {
    %c0_i32 = arith.constant 0 : i32
    %c0_i32_0 = arith.constant 0 : i32
    return %arg0, %arg1, %c0_i32 : i32, i32, i32
  }
}

</mosaic_0001>

<bundles_post_ra>
// kernel: tpu_custom_call.1
= control target key start
LH: loop header
LB: loop body
LE: loop exit
PB: predicated region body
PF: predicated region fallthrough
CT: control target
= control target key end

     0   :  { %6 = vsyncpa [#allocation3], 0  ;;  %s125_s0 = inlined_call_operand.hbm [shape: f32[8,128], index: 0, kind: input, shape index: {}]   ;;  %s126_s1 = inlined_call_operand.hbm [shape: f32[8,128], index: 1, kind: output, shape index: {}]  }
   0x1   :  { %7 = vsyncpa [#allocation4], 0  ;;  %s89_s6 = smov [#allocation2]   ;;  %s41_s10 = scalar_lea.hbm %s125_s0, 128 }
   0x2   :  { %s14_s7 = sshll.u32 %s89_s6, 4  ;;  %p42_p0 = scmp.ne.s32.totalorder %s125_s0, %s41_s10  ;;  %s15_s7 = int_to_ptr.vmem [resolvable:$true] %s14_s7 }
   0x3   :  { %p45_p1 = scmp.lt.u32.totalorder %s41_s10, %s125_s0 }
   0x5   :  { %p47_p2 = pnand %p45_p1, %p42_p0 }
   0x7   :  { %50 = shalt.err (!%p47_p2)
}
   0x8   :  { %s51_s15 = scalar_lea.vmem %s15_s7, 128  ;;  %p56_p4 = scmp.lt.s32.totalorder %s15_s7, %s15_s7 }
   0x9   :  { %p52_p3 = scmp.ne.s32.totalorder %s15_s7, %s51_s15  ;;  %p57_p5 = scmp.lt.s32.totalorder %s51_s15, %s51_s15 }
   0xb   :  { %p58_p6 = por %p57_p5, %p56_p4 }
   0xd   :  { %p59_p7 = pnand %p58_p6, %p52_p3 }
   0xf   :  { %62 = shalt.err (!%p59_p7)
}
  0x10   :  { %17 = dma.hbm_to_vmem [thread:$0]  %s125_s0, 128, %s15_s7, [#allocation3]  }
  0x11   :  { %85 = dma.done.wait [#allocation3], 128  }
  0x12   :  { %86 = vsyncadd [#allocation3], 4294967168  ;;  %s90_s18 = smov [#allocation5]   ;;  %v21_v0 = vld [vmem:[#allocation2] sm:$0xff] }
  0x13   :  { %s30_s19 = sshll.u32 %s90_s18, 4  ;;  %v22_v1 = vadd.f32 1.0, %v21_v0  ;;  %s31_s19 = int_to_ptr.vmem [resolvable:$true] %s30_s19 }
  0x14   :  { %s63_s20 = scalar_lea.vmem %s31_s19, 128  ;;  %p68_p9 = scmp.lt.s32.totalorder %s31_s19, %s31_s19 }
  0x15   :  { %23 = vst [vmem:[#allocation5] sm:$0xff] %v22_v1  ;;  %p64_p8 = scmp.ne.s32.totalorder %s31_s19, %s63_s20  ;;  %p69_p10 = scmp.lt.s32.totalorder %s63_s20, %s63_s20 }
  0x17   :  { %p70_p11 = por %p69_p10, %p68_p9 }
  0x19   :  { %p71_p12 = pnand %p70_p11, %p64_p8 }
  0x1b   :  { %74 = shalt.err (!%p71_p12)
}
  0x1c   :  { %s75_s23 = scalar_lea.hbm %s126_s1, 128 }
  0x1d   :  { %p76_p13 = scmp.ne.s32.totalorder %s126_s1, %s75_s23  ;;  %p79_p0 = scmp.lt.u32.totalorder %s75_s23, %s126_s1 }
  0x1f   :  { %p81_p1 = pnand %p79_p0, %p76_p13 }
  0x21   :  { %84 = shalt.err (!%p81_p1)
}
  0x22   :  { %33 = dma.vmem_to_hbm [thread:$0]  %s31_s19, 128, %s126_s1, [#allocation4]  }
  0x23   :  { %87 = dma.done.wait [#allocation4], 128  }
  0x24   :  { %88 = vsyncadd [#allocation4], 4294967168 }
  0x25   :  { %37 = vsyncpa [#allocation3], 1 }
  0x26   :  { %38 = vsyncpa [#allocation4], 1 }

// kernel: tpu_custom_call.1
= control target key start
LH: loop header
LB: loop body
LE: loop exit
PB: predicated region body
PF: predicated region fallthrough
CT: control target
= control target key end

     0   :  { %s3143_s0 = inlined_call_operand.hbm [shape: f32[2,8,32], index: 0, kind: input, shape index: {}]   ;;  %s3144_s1 = inlined_call_operand.hbm [shape: f32[2,8,32], index: 1, kind: input, shape index: {}]   ;;  %s3145_s2 = inlined_call_operand.vmem [shape: f32[1,32], index: 2, kind: input, shape index: {}]   ;;  %s3146_s3 = inlined_call_operand.vmem [shape: f32[1,32], index: 3, kind: input, shape index: {}]   ;;  %s3147_s4 = inlined_call_operand.hbm [shape: bf16[32,32], index: 4, kind: input, shape index: {}]   ;;  %s3148_s5 = inlined_call_operand.hbm [shape: f32[1,32], index: 5, kind: input, shape index: {}]   ;;  %s3149_s6 = inlined_call_operand.vmem [shape: bf16[32,64], index: 6, kind: input, shape index: {}]   ;;  %s3150_s7 = inlined_call_operand.hbm [shape: f32[1,64], index: 7, kind: input, shape index: {}]   ;;  %s3151_s8 = inlined_call_operand.hbm [shape: bf16[32,32], index: 8, kind: input, shape index: {}]   ;;  %s3152_s9 = inlined_call_operand.vmem [shape: f32[1,32], index: 9, kind: input, shape index: {}]   ;;  %s3153_s10 = inlined_call_operand.vmem [shape: s32[8,8], index: 10, kind: input, shape index: {}]   ;;  %s3154_s11 = inlined_call_operand.hbm [shape: f32[2,8,32], index: 11, kind: output, shape index: {}]  }
   0x1   :  { %3161 = sst [smem:[#allocation24_spill]] %s3146_s3 }
   0x2   :  { %3162 = sst [smem:[#allocation25_spill]] %s3147_s4 }
   0x3   :  { %3163 = sst [smem:[#allocation26_spill]] %s3148_s5 }
   0x4   :  { %3164 = sst [smem:[#allocation27_spill]] %s3150_s7 }
   0x5   :  { %3165 = sst [smem:[#allocation28_spill]] %s3151_s8 }
   0x6   :  { %3166 = sst [smem:[#allocation29_spill]] %s3152_s9 }
   0x7   :  { %3167 = sst [smem:[#allocation30_spill]] %s3153_s10 }
   0x8   :  { %3168 = sst [smem:[#allocation31_spill]] %s3154_s11 }
   0x9   :  { %16 = vsyncpa [#allocation5], 0 }
   0xa   :  { %18 = vsyncpa [#allocation5 + $0x1], 0 }
   0xb   :  { %19 = vsyncpa [#allocation8], 0 }
   0xc   :  { %21 = vsyncpa [#allocation8 + $0x1], 0 }
   0xd   :  { %22 = vsyncpa [#allocation11], 0 }
   0xe   :  { %23 = vsyncpa [#allocation14], 0 }
   0xf   :  { %24 = vsyncpa [#allocation6], 0 }
  0x10   :  { %26 = vsyncpa [#allocation6 + $0x1], 0  ;;  %s2649_s17 = smov 0   ;;  %s2651_s18 = smov 0  }
  0x11   :  { %s2653_s19 = smov 0   ;;  %s2655_s20 = smov 0  }
  0x12   :  { %s2657_s21 = smov 0   ;;  %s2659_s22 = smov 0  }
  0x13 LB: > { %3169 = sst [smem:[#allocation22_spill]] %s2558_s20  ;;  %s2680_s23 = sadd.s32 4294967295, %s2566_s22   ;;  %s2566_s22 = sphi %s2659_s22, %s32_s22   ;;  %s2562_s21 = sphi %s2657_s21, %s3205_s21   ;;  %s2558_s20 = sphi %s2655_s20, %s3204_s20   ;;  %s2554_s19 = sphi %s2653_s19, %s3203_s19   ;;  %s2550_s18 = sphi %s2651_s18, %s3202_s18   ;;  %s2546_s17 = sphi %s2649_s17, %s3201_s17  }
  0x14   : > { %p1994_p0 = scmp.ge.s32.totalorder %s2566_s22, 1  ;;  %p3156_p1 = scmp.eq.s32.totalorder %s2680_s23, 0 }
  0x15   : > { %p325_p2 = scmp.lt.s32.totalorder %s2566_s22, 3  ;;  %s2568_s25 = smov [#allocation9]  }
  0x16   : > { %s343_s26 = sshll.u32 %s2568_s25, 4  ;;  %s2569_s28 = smov [#allocation10]   ;;  %s2689_s26 = int_to_ptr.vmem [resolvable:$true] %s343_s26 }
  0x17   : > { %p2685_p3 = pnand %p1994_p0, %p325_p2  ;;  %s357_s29 = sshll.u32 %s2569_s28, 4  ;;  %s2700_s29 = int_to_ptr.vmem [resolvable:$true] %s357_s29 }
  0x18   : > { %s2570_s30 = smov [#allocation12]   ;;  %s3172_s4 = sld [smem:[#allocation25_spill]] }
  0x19   : > { %s3170_s24 = scalar_select %p2685_p3, 1, 0 }
  0x1a   : > { %p2170_p4 = pneg %p2685_p3  ;;  %s2702_s12 = sshll.u32 %s2570_s30, 4  ;;  %s372_s12 = int_to_ptr.vmem [resolvable:$true] %s2702_s12 }
  0x1c   : > { %p2696_p6 = pnand %p2170_p4, %p3156_p1 }
  0x1e   : > { %s2296_s15 = scalar_lea.hbm %s3172_s4, 256  ;;  %p2712_p8 = pneg %p2696_p6 }
  0x1f   : > { %p2297_p7 = scmp.ne.s32.totalorder %s3172_s4, %s2296_s15  ;;  %p2303_p11 = scmp.lt.u32.totalorder %s2296_s15, %s3172_s4 }
  0x21   : > { %p2299_p9 = pnand %p2712_p8, %p2297_p7 }
  0x23   : > { %p2300_p10 = pneg %p2299_p9 }
  0x25   : > { %p2305_p12 = pnand %p2303_p11, %p2300_p10 }
  0x27   : > { %2308 = shalt.err (!%p2305_p12)
}
  0x28   : > { %s2309_s13 = scalar_lea.vmem %s2689_s26, 256  ;;  %p2317_p4 = scmp.lt.s32.totalorder %s2689_s26, %s2689_s26 }
  0x29   : > { %p2310_p13 = scmp.ne.s32.totalorder %s2689_s26, %s2309_s13  ;;  %p2318_p5 = scmp.lt.s32.totalorder %s2309_s13, %s2309_s13 }
  0x2b   : > { %p2312_p0 = pnand %p2310_p13, %p2712_p8  ;;  %p2319_p7 = por %p2318_p5, %p2317_p4 }
  0x2d   : > { %p2313_p2 = pneg %p2312_p0 }
  0x2f   : > { %p2320_p9 = pnand %p2319_p7, %p2313_p2 }
  0x31   : > { %2323 = shalt.err (!%p2320_p9)
}
  0x32   : > { %s2571_s14 = smov 64   ;;  %s2572_s15 = smov 4  }
  0x33   : > { %2173 = dma.hbm_to_vmem [thread:$0]  (!%p2696_p6), %s3172_s4, 256, %s2689_s26, [#allocation8], %s2571_s14, %s2571_s14, %s2572_s15  }
  0x34   : > { %s3174_s5 = sld [smem:[#allocation26_spill]] }
  0x3a   : > { %s2324_s13 = scalar_lea.hbm %s3174_s5, 16 }
  0x3b   : > { %p2325_p5 = scmp.ne.s32.totalorder %s3174_s5, %s2324_s13  ;;  %p2331_p12 = scmp.lt.u32.totalorder %s2324_s13, %s3174_s5 }
  0x3d   : > { %p2327_p10 = pnand %p2325_p5, %p2712_p8 }
  0x3f   : > { %p2328_p11 = pneg %p2327_p10 }
  0x41   : > { %p2333_p13 = pnand %p2331_p12, %p2328_p11 }
  0x43   : > { %2336 = shalt.err (!%p2333_p13)
}
  0x44   : > { %s2337_s26 = scalar_lea.vmem %s2700_s29, 16  ;;  %s2344_s9 = scalar_lea.vmem %s2700_s29, 32 }
  0x45   : > { %p2338_p0 = scmp.ne.s32.totalorder %s2700_s29, %s2337_s26  ;;  %p2345_p7 = scmp.lt.s32.totalorder %s2700_s29, %s2700_s29 }
  0x46   : > { %p2346_p9 = scmp.lt.s32.totalorder %s2344_s9, %s2337_s26 }
  0x47   : > { %p2340_p2 = pnand %p2338_p0, %p2712_p8 }
  0x48   : > { %p2347_p5 = por %p2346_p9, %p2345_p7 }
  0x49   : > { %p2341_p4 = pneg %p2340_p2 }
  0x4b   : > { %p2348_p10 = pnand %p2347_p5, %p2341_p4 }
  0x4d   : > { %2351 = shalt.err (!%p2348_p10)
}
  0x4e   : > { %2176 = dma.hbm_to_vmem [thread:$0]  (!%p2696_p6), %s3174_s5, 16, %s2700_s29, [#allocation11]  }
  0x4f   : > { %s3175_s7 = sld [smem:[#allocation27_spill]] }
  0x55   : > { %s2352_s25 = scalar_lea.hbm %s3175_s7, 16 }
  0x56   : > { %p2353_p11 = scmp.ne.s32.totalorder %s3175_s7, %s2352_s25  ;;  %p2359_p0 = scmp.lt.u32.totalorder %s2352_s25, %s3175_s7 }
  0x58   : > { %p2355_p12 = pnand %p2353_p11, %p2712_p8 }
  0x5a   : > { %p2356_p13 = pneg %p2355_p12 }
  0x5c   : > { %p2361_p2 = pnand %p2359_p0, %p2356_p13 }
  0x5e   : > { %2364 = shalt.err (!%p2361_p2)
}
  0x5f   : > { %s2365_s9 = scalar_lea.vmem %s372_s12, 16  ;;  %s2372_s29 = scalar_lea.vmem %s372_s12, 32 }
  0x60   : > { %p2366_p4 = scmp.ne.s32.totalorder %s372_s12, %s2365_s9  ;;  %p2373_p5 = scmp.lt.s32.totalorder %s372_s12, %s372_s12 }
  0x61   : > { %p2374_p10 = scmp.lt.s32.totalorder %s2372_s29, %s2365_s9 }
  0x62   : > { %p2368_p7 = pnand %p2366_p4, %p2712_p8 }
  0x63   : > { %p2375_p1 = por %p2374_p10, %p2373_p5 }
  0x64   : > { %p2369_p9 = pneg %p2368_p7 }
  0x66   : > { %p2376_p3 = pnand %p2375_p1, %p2369_p9 }
  0x68   : > { %2379 = shalt.err (!%p2376_p3)
}
  0x69   : > { %2179 = dma.hbm_to_vmem [thread:$0]  (!%p2696_p6), %s3175_s7, 16, %s372_s12, [#allocation11]  }
  0x6a   : > { %s2573_s20 = smov [#allocation13]   ;;  %s3176_s8 = sld [smem:[#allocation28_spill]] }
  0x6b   : > { %s381_s16 = sshll.u32 %s2573_s20, 4  ;;  %s382_s16 = int_to_ptr.vmem [resolvable:$true] %s381_s16 }
  0x70   : > { %s2380_s30 = scalar_lea.hbm %s3176_s8, 256 }
  0x71   : > { %p2381_p11 = scmp.ne.s32.totalorder %s3176_s8, %s2380_s30  ;;  %p2387_p12 = scmp.lt.u32.totalorder %s2380_s30, %s3176_s8 }
  0x73   : > { %p2383_p1 = pnand %p2381_p11, %p2712_p8 }
  0x75   : > { %p2384_p3 = pneg %p2383_p1 }
  0x77   : > { %p2389_p13 = pnand %p2387_p12, %p2384_p3 }
  0x79   : > { %2392 = shalt.err (!%p2389_p13)
}
  0x7a   : > { %s2393_s12 = scalar_lea.vmem %s382_s16, 256  ;;  %p2401_p7 = scmp.lt.s32.totalorder %s382_s16, %s382_s16 }
  0x7b   : > { %p2394_p0 = scmp.ne.s32.totalorder %s382_s16, %s2393_s12  ;;  %p2402_p9 = scmp.lt.s32.totalorder %s2393_s12, %s2393_s12 }
  0x7d   : > { %p2396_p2 = pnand %p2394_p0, %p2712_p8  ;;  %p2403_p5 = por %p2402_p9, %p2401_p7 }
  0x7f   : > { %p2397_p4 = pneg %p2396_p2 }
  0x81   : > { %p2404_p10 = pnand %p2403_p5, %p2397_p4 }
  0x83   : > { %2407 = shalt.err (!%p2404_p10)
}
  0x84   : > { %2182 = dma.hbm_to_vmem [thread:$0]  (!%p2696_p6), %s3176_s8, 256, %s382_s16, [#allocation14], %s2571_s14, %s2571_s14, %s2572_s15  }
  0x85   : > { %s1993_s11 = sadd.s32 4294967294, %s2566_s22   ;;  %s44_s27 = sadd.s32 1, %s2562_s21 }
  0x86   : > { %p46_p8 = scmp.ge.s32.totalorder %s44_s27, 2  ;;  %s53_s20 = sadd.s32 1, %s2554_s19 }
  0x87   : > { %p60_p11 = scmp.ne.s32.totalorder %s2554_s19, %s2550_s18  ;;  %p61_p1 = scmp.eq.s32.totalorder %s2566_s22, 0 }
  0x88   : > { %s3207_s27 = smov (%p46_p8, %s44_s27), 0  ;;  %p66_p12 = scmp.ne.s32.totalorder %s2550_s18, %s2546_s17 }
  0x89   : > { %3177 = sst [smem:[#allocation23_spill]] %s3207_s27  ;;  %p2808_p3 = por %p61_p1, %p60_p11 }
  0x8a   : > { %s48_s14 = ssub.s32 %s2562_s21, %s3207_s27  ;;  %p312_p6 = scmp.eq.s32.totalorder %s2680_s23, 1 }
  0x8b   : > { %p51_p13 = scmp.eq.s32.totalorder %s48_s14, 0  ;;  %p3179_p0 = scmp.eq.s32.totalorder %s2680_s23, 0 }
  0x8c   : > { %p2823_p4 = por %p312_p6, %p60_p11  ;;  %p318_p7 = scmp.eq.s32.totalorder %s1993_s11, 1 }
  0x8d   : > { %p2819_p2 = por %p3179_p0, %p66_p12  ;;  %p2198_p5 = scmp.lt.s32.totalorder %s2566_s22, 2 }
  0x8e   : > { %s3181_s16 = scalar_select %p2823_p4, 1, 0 }
  0x8f   : > { %s3180_s15 = scalar_select %p2819_p2, 1, 0 }
  0x90   : > { %s2828_s28 = scalar_select %p51_p13, %s2554_s19, %s53_s20  }
  0x91   : > { %p2830_p9 = por %p318_p7, %p66_p12  ;;  %s405_s13 = sand.u32 1, %s2554_s19  }
  0x92   : > { %s2002_s26 = sshll.u32 %s2562_s21, 7  ;;  %s2837_s9 = sshll.u32 %s405_s13, 3 }
  0x93   : > { %s3182_s30 = scalar_select %p2830_p9, 1, 0 }
  0x94   : > { %s2842_s3 = scalar_lea.hbm %s3143_s0, %s2002_s26  ;;  %s409_s10 = scalar_lea.vmem [#allocation4], %s2837_s9 }
  0x95   : > { %s417_s11 = sshll.u32 %s409_s10, 4  ;;  %p2847_p10 = pnand %p2198_p5, %p2808_p3  ;;  %s2851_s11 = int_to_ptr.vmem [resolvable:$true] %s417_s11 }
  0x96   : > { %s2856_s12 = scalar_lea.hbm %s3144_s1, %s2002_s26  ;;  %s406_s4 = scalar_lea.sflag [#allocation5], %s405_s13 }
  0x97   : > { %s2408_s5 = scalar_lea.hbm %s2842_s3, 128  ;;  %p2410_p11 = pneg %p2847_p10 }
  0x98   : > { %p2409_p8 = scmp.ne.s32.totalorder %s2842_s3, %s2408_s5  ;;  %s2413_s7 = scalar_lea.hbm %s3143_s0, 256 }
  0x99   : > { %p2414_p12 = scmp.lt.u32.totalorder %s2842_s3, %s3143_s0  ;;  %p2415_p6 = scmp.lt.u32.totalorder %s2413_s7, %s2408_s5 }
  0x9a   : > { %p2411_p1 = pnand %p2410_p11, %p2409_p8  ;;  %p2417_p0 = scmp.lt.u32.totalorder %s2408_s5, %s2842_s3 }
  0x9b   : > { %p2416_p13 = por %p2415_p6, %p2414_p12 }
  0x9c   : > { %p2412_p3 = pneg %p2411_p1 }
  0x9d   : > { %p2418_p7 = por %p2417_p0, %p2416_p13 }
  0x9f   : > { %p2419_p5 = pnand %p2418_p7, %p2412_p3 }
  0xa1   : > { %2422 = shalt.err (!%p2419_p5)
}
  0xa2   : > { %s2423_s13 = scalar_lea.vmem %s2851_s11, 128  ;;  %s2574_s26 = smov [#allocation4]  }
  0xa3   : > { %p2424_p8 = scmp.ne.s32.totalorder %s2851_s11, %s2423_s13  ;;  %s2428_s14 = sshll.u32 %s2574_s26, 4  ;;  %s2429_s14 = int_to_ptr.vmem [resolvable:$false] %s2428_s14 }
  0xa4   : > { %s2430_s8 = scalar_lea.vmem %s2429_s14, 256  ;;  %p2431_p4 = scmp.lt.s32.totalorder %s2851_s11, %s2429_s14 }
  0xa5   : > { %p2426_p1 = pnand %p2424_p8, %p2410_p11  ;;  %p2432_p12 = scmp.lt.s32.totalorder %s2430_s8, %s2423_s13 }
  0xa7   : > { %p2427_p9 = pneg %p2426_p1  ;;  %p2433_p6 = por %p2432_p12, %p2431_p4 }
  0xa9   : > { %p2434_p13 = pnand %p2433_p6, %p2427_p9 }
  0xab   : > { %2437 = shalt.err (!%p2434_p13)
}
  0xac   : > { %2186 = dma.hbm_to_vmem [thread:$0]  (!%p2847_p10), %s2842_s3, 128, %s2851_s11, %s406_s4  }
  0xad   : > { %s424_s5 = sand.u32 1, %s2566_s22   ;;  %s428_s7 = scalar_lea.vmem [#allocation7], %s2837_s9 }
  0xae   : > { %s435_s27 = sshll.u32 %s428_s7, 4  ;;  %s425_s29 = scalar_lea.sflag [#allocation8], %s424_s5  ;;  %s436_s27 = int_to_ptr.vmem [resolvable:$true] %s435_s27 }
  0xaf   : > { %s2438_s25 = scalar_lea.hbm %s2856_s12, 128  ;;  %s2443_s26 = scalar_lea.hbm %s3144_s1, 256 }
  0xb0   : > { %p2439_p4 = scmp.ne.s32.totalorder %s2856_s12, %s2438_s25  ;;  %p2444_p0 = scmp.lt.u32.totalorder %s2856_s12, %s3144_s1 }
  0xb1   : > { %p2445_p7 = scmp.lt.u32.totalorder %s2443_s26, %s2438_s25  ;;  %p2447_p8 = scmp.lt.u32.totalorder %s2438_s25, %s2856_s12 }
  0xb2   : > { %p2441_p9 = pnand %p2439_p4, %p2410_p11 }
  0xb3   : > { %p2446_p5 = por %p2445_p7, %p2444_p0 }
  0xb4   : > { %p2442_p3 = pneg %p2441_p9 }
  0xb5   : > { %p2448_p1 = por %p2447_p8, %p2446_p5 }
  0xb7   : > { %p2449_p12 = pnand %p2448_p1, %p2442_p3 }
  0xb9   : > { %2452 = shalt.err (!%p2449_p12)
}
  0xba   : > { %s2453_s4 = scalar_lea.vmem %s436_s27, 128  ;;  %s2575_s9 = smov [#allocation7]  }
  0xbb   : > { %p2454_p6 = scmp.ne.s32.totalorder %s436_s27, %s2453_s4  ;;  %s2458_s3 = sshll.u32 %s2575_s9, 4  ;;  %s2459_s3 = int_to_ptr.vmem [resolvable:$false] %s2458_s3 }
  0xbc   : > { %s2460_s11 = scalar_lea.vmem %s2459_s3, 256  ;;  %p2461_p9 = scmp.lt.s32.totalorder %s436_s27, %s2459_s3 }
  0xbd   : > { %p2456_p13 = pnand %p2454_p6, %p2410_p11  ;;  %p2462_p2 = scmp.lt.s32.totalorder %s2460_s11, %s2453_s4 }
  0xbf   : > { %p2457_p4 = pneg %p2456_p13  ;;  %p2463_p0 = por %p2462_p2, %p2461_p9 }
  0xc1   : > { %p2464_p7 = pnand %p2463_p0, %p2457_p4 }
  0xc3   : > { %2467 = shalt.err (!%p2464_p7)
}
  0xc4   : > { %2189 = dma.hbm_to_vmem [thread:$0]  (!%p2847_p10), %s2856_s12, 128, %s436_s27, %s425_s29  }
  0xc5   : > { %p3184_p3 = scmp.ne.s32.totalorder %s3170_s24, 0 }
  0xc6   : > { %s2907_s5 = sand.u32 (!%p3184_p3), 1, %s2550_s18   ;;  %p3185_p2 = scmp.ne.s32.totalorder (!%p3184_p3), %s3180_s15, 0 }
  0xc7   : > { %444 = sbr.rel (%p3184_p3) target bundleno = 2354 (0x932), region = 64  ;;  %s2910_s7 = sshll.u32 (!%p3184_p3), %s2907_s5, 3 }
  0xc8   : > { %s447_s25 = scalar_lea.sflag (!%p3184_p3), [#allocation5], %s2907_s5  ;;  %s450_s10 = scalar_lea.vmem (!%p3184_p3), [#allocation4], %s2910_s7 }
  0xce   : > { %2521 = dma.done.wait (%p3185_p2), %s447_s25, 128  }
  0xcf   : > { %2523 = vsyncadd (%p3185_p2), %s447_s25, 4294967168  ;;  %s455_s24 = sand.u32 1, %s2680_s23   ;;  %s459_s12 = scalar_lea.vmem [#allocation7], %s2910_s7 }
  0xd0   : > { %s456_s20 = scalar_lea.sflag [#allocation8], %s455_s24 }
  0xd1   : > { %2525 = dma.done.wait (%p3185_p2), %s456_s20, 128  }
  0xd2   : > { %2527 = vsyncadd (%p3185_p2), %s456_s20, 4294967168  ;;  %p3186_p10 = scmp.eq.s32.totalorder %s2680_s23, 0 }
  0xd4   : > { %2529 = dma.done.wait (%p3186_p10), [#allocation8], 256   ;;  %p3187_p11 = pmov %p3186_p10 }
  0xd5   : > { %p3188_p5 = pmov %p3186_p10 }
  0xd6   : > { %2531 = vsyncadd (%p3187_p11), [#allocation8], 4294967040 }
  0xd7   : > { %2533 = dma.done.wait (%p3188_p5), [#allocation11], 32   ;;  %p3189_p8 = pmov %p3188_p5 }
  0xd8   : > { %p3190_p1 = pmov %p3188_p5 }
  0xd9   : > { %2535 = vsyncadd (%p3189_p8), [#allocation11], 4294967264 }
  0xda   : > { %2537 = dma.done.wait (%p3190_p1), [#allocation14], 256   ;;  %p3191_p12 = pmov %p3190_p1 }
  0xdb   : > { %vm535_vm0 = vcmask 261120   ;;  %v532_v0 = vld [vmem:[%s459_s12] sm:$0xff]  ;;  %v2936_v1 = vld [vmem:[%s450_s10] sm:$0xff]  ;;  %v2576_v16 = vmov 0.0   ;;  %vm2577_vm1 = vmmov 0   ;;  %s3192_s4 = sld [smem:[#allocation24_spill]]  ;;  %v756_v56 = vlaneseq }
  0xdc   : > { %2539 = vsyncadd (%p3191_p12), [#allocation14], 4294967040  ;;  %v536_v2 = vsel %vm535_vm0, %v532_v0, 0.0  ;;  %v645_v3 = vsel %vm535_vm0, %v2936_v1, 0.0  ;;  %v2270_v14 = vld [vmem:[%s3149_s6] sm:$0xff]   ;;  %v2272_v15 = vld [vmem:[#allocation9] sm:$0xff]   ;;  %2076 = vmatprep.subr.bf16.mxu0 %v2576_v16  ;;  %2084 = vmatprep.subr.bf16.mxu1 %v2576_v16 }
  0xdd   : > { %537 = vadd.xlane.f32.xlu0 %v536_v2  ;;  %2077 = vmatpush3.bf16.msra.mxu0 %v2270_v14  ;;  %v2271_v17 = vld [vmem:[%s3149_s6 + $0x8] sm:$0xff]   ;;  %v2273_v18 = vld [vmem:[#allocation9 + $0x8] sm:$0xff]   ;;  %v2013_v26 = vld [vmem:[%s3145_s2] ss:$0 sm:$0xff]  ;;  %vm632_vm2 = vcmask 257024   ;;  %s2578_s9 = smov 120  }
  0xde   : > { %2085 = vmatpush3.bf16.msra.mxu1 %v2272_v15  ;;  %2078 = vmatprep.subr.bf16.mxu0 %v2576_v16  ;;  %v2015_v37 = vld [vmem:[#allocation12] ss:$0 sm:$0xff]  ;;  %v2022_v48 = vld [vmem:[#allocation10] ss:$0 sm:$0xff]  ;;  %s2579_s3 = smov 112   ;;  %s2580_s11 = smov 104  }
  0xdf   : > { %2080 = vmatprep.mubr.msk.bf16.mxu0 %vm2577_vm1, %v2576_v16  ;;  %2086 = vmatprep.subr.bf16.mxu1 %v2576_v16  ;;  %v2581_v54 = vmov 1983009808   ;;  %v2582_v58 = vmov 1934713408   ;;  %v757_v61 = vshrl.u32 %v756_v56, 7  ;;  %vm985_vm3 = vcmask 1043456  }
  0xe0   : > { %2088 = vmatprep.mubr.msk.bf16.mxu1 %vm2577_vm1, %v2576_v16  ;;  %v754_v55 = vunpack.c.l.s4 %v2581_v54  ;;  %v786_v59 = vunpack.c.l.s4 %v2582_v58  ;;  %vm981_vm4 = vcmask 64512   ;;  %s3193_s24 = sld [smem:[#allocation30_spill]]  ;;  %s2584_s20 = smov 96   ;;  %vm1748_vm6 = vcmask 130048  }
  0xe1   : > { %646 = vadd.xlane.f32.xlu0 %v645_v3  ;;  %2079 = vmatpush3.bf16.msra.mxu0 %v2271_v17  ;;  %v2014_v28 = vld [vmem:[%s3192_s4] ss:$0 sm:$0xff]  ;;  %s2585_s12 = smov 16   ;;  %s2586_s23 = smov 8   ;;  %vm1750_vm7 = vcmask 195584  }
  0xe2   : > { %2092 = vmatprep.subr.bf16.mxu0 %v2576_v16  ;;  %2087 = vmatpush3.bf16.msra.mxu1 %v2273_v18  ;;  %v755_v60 = vunpack.c.0.s8 %v754_v55  ;;  %s3194_s15 = sld [smem:[#allocation22_spill]]  ;;  %s2587_s27 = smov 24  }
  0xe3   : > { %2098 = vmatprep.subr.bf16.mxu1 %v2576_v16  ;;  %s3195_s26 = sld [smem:[#allocation29_spill]]  ;;  %s522_s8 = scalar_lea.vmem [#allocation15], %s2910_s7 }
  0xe4   : > { %v2982_v2 = vsub.s32 %v755_v60, %v757_v61  ;;  %s1836_s4 = sshll.u32 %s522_s8, 4  ;;  %s1822_s7 = scalar_lea.sflag [#allocation6], %s2907_s5  ;;  %s3095_s4 = int_to_ptr.vmem [resolvable:$true] %s1836_s4 }
  0xe5   : > { %s2468_s10 = scalar_lea.vmem %s3095_s4, 128  ;;  %p3197_p13 = scmp.ne.s32.totalorder %s3181_s16, 0 }
  0xe6   : > { %v849_v58 = vld [vmem:[%s3193_s24] sm:$0xff]  ;;  %p2469_p6 = scmp.ne.s32.totalorder %s3095_s4, %s2468_s10  ;;  %s2588_s24 = smov [#allocation15]  }
  0xe7   : > { %vm850_vm5 = vcmp.gt.s32.totalorder %v849_v58, 0 }
  0xe8   : > { %s2047_s14 = sshll.u32 %s3194_s15, 7  ;;  %p2470_p4 = pnand %p2469_p6, %p3197_p13 }
  0xea   : > { %p2471_p9 = pneg %p2470_p4 }
 0x16a   : > { %v538_v4 = vpop.xlane.xlu0 %537 }
 0x16b   : > { %v540_v5 = vmul.f32 0.03125, %v538_v4 }
 0x16d   : > { %v541_v6 = vsub.f32 %v532_v0, %v540_v5  ;;  %v787_v0 = vunpack.c.0.s8 %v786_v59  ;;  %v3028_v59 = vsel %vm850_vm5, 1.0, %v2576_v16 }
 0x16e   : > { %v647_v7 = vpop.xlane.xlu0 %646  ;;  %v2027_v60 = vadd.f32 -1.0, %v3028_v59 }
 0x16f   : > { %v649_v8 = vmul.f32 0.03125, %v647_v7  ;;  %v542_v9 = vmul.f32 %v541_v6, %v541_v6 }
 0x171   : > { %v650_v10 = vsub.f32 %v2936_v1, %v649_v8  ;;  %v543_v11 = vsel %vm535_vm0, %v542_v9, 0.0  ;;  %v2984_v8 = vsub.s32 %v787_v0, %v757_v61  ;;  %v854_v61 = vmul.f32 1e+09, %v2027_v60 }
 0x172   : > { %544 = vadd.xlane.f32.xlu1 %v543_v11 }
 0x173   : > { %v651_v12 = vmul.f32 %v650_v10, %v650_v10 }
 0x175   : > { %v652_v13 = vsel %vm535_vm0, %v651_v12, 0.0 }
 0x176   : > { %653 = vadd.xlane.f32.xlu1 %v652_v13 }
 0x1ff   : > { %v545_v19 = vpop.xlane.xlu1 %544 }
 0x200   : > { %v546_v20 = vmul.f32 0.03125, %v545_v19 }
 0x202   : > { %v547_v21 = vadd.f32 1e-05, %v546_v20 }
 0x203   : > { %v654_v22 = vpop.xlane.xlu1 %653 }
 0x204   : > { %2276 = vrsqrt.f32 %v547_v21  ;;  %v655_v23 = vmul.f32 0.03125, %v654_v22 }
 0x206   : > { %v656_v24 = vadd.f32 1e-05, %v655_v23 }
 0x208   : > { %2278 = vrsqrt.f32 %v656_v24 }
 0x20e   : > { %v2277_v25 = vpop.eup %2276 }
 0x20f   : > { %v549_v27 = vmul.f32 %v2277_v25, %v541_v6 }
 0x211   : > { %v556_v29 = vmul.f32 %v2013_v26, %v549_v27 }
 0x212   : > { %v2279_v30 = vpop.eup %2278 }
 0x213   : > { %v563_v31 = vadd.f32 %v2014_v28, %v556_v29  ;;  %v658_v32 = vmul.f32 %v2279_v30, %v650_v10 }
 0x215   : > { %v564_v33 = vpack.c.bf16 %v563_v31, %v563_v31  ;;  %v665_v34 = vmul.f32 %v2013_v26, %v658_v32 }
 0x217   : > { %2081 = vmatmul.mubr.msk.bf16.vlgmr.msra.gmra.mrb[0].mxu0 %vm535_vm0, %v564_v33  ;;  %v672_v35 = vadd.f32 %v2014_v28, %v665_v34 }
 0x218   : > { %2094 = vmatprep.mubr.msk.bf16.mxu0 %vm2577_vm1, %v2576_v16 }
 0x219   : > { %v673_v36 = vpack.c.bf16 %v672_v35, %v672_v35 }
 0x21b   : > { %2089 = vmatmul.mubr.msk.bf16.vlgmr.msra.gmra.mrb[0].mxu1 %vm535_vm0, %v673_v36 }
 0x21c   : > { %2100 = vmatprep.mubr.msk.bf16.mxu1 %vm2577_vm1, %v2576_v16 }
 0x2ea   : > { %v625_v38 = vpop.f32.mrb[0].mxu0 }
 0x2eb   : > { %v626_v39 = vadd.f32 %v2015_v37, %v625_v38  ;;  %v2082_v40 = vpop.f32.mrb[1].mxu0 }
 0x2ec   : > { %v628_v41 = vpop.f32.mrb[2].mxu0  ;;  %v2583_v40 = vmov 0  }
 0x2ed   : > { %v2972_v42 = vpack.c.bf16 %v626_v39, %v626_v39  ;;  %v2083_v43 = vpop.f32.mrb[3].mxu0 }
 0x2ee   : > { %v734_v44 = vpop.f32.mrb[0].mxu1 }
 0x2ef   : > { %633 = vst.msk [vmem:[#allocation2] sm:$0xf] %vm632_vm2, %v2972_v42  ;;  %v2090_v45 = vpop.f32.mrb[1].mxu1  ;;  %v735_v49 = vadd.f32 %v2022_v48, %v734_v44 }
 0x2f0   : > { %v737_v46 = vpop.f32.mrb[2].mxu1 }
 0x2f1   : > { %v2091_v47 = vpop.f32.mrb[3].mxu1  ;;  %v740_v51 = vmul.f32 0.35355338, %v735_v49 }
 0x2f6   : > { %v827_v50 = vld [vmem:[#allocation2] sm:$0xf] }
 0x2f7   : > { %829 = vrot.lane.b32.xlu0 %v827_v50, %s2578_s9  ;;  %832 = vrot.lane.b32.xlu1 %v827_v50, %s2579_s3 }
 0x2fb   : > { %835 = vrot.lane.b32.xlu1 %v827_v50, %s2580_s11  ;;  %745 = vrot.lane.b32.xlu0 %v740_v51, %s2579_s3 }
 0x2ff   : > { %742 = vrot.lane.b32.xlu1 %v740_v51, %s2578_s9 }
 0x303   : > { %748 = vrot.lane.b32.xlu1 %v740_v51, %s2580_s11 }
 0x319   : > { %917 = vxpose.xlu0.c.b16.start.end [1/1] (short) (narrow) %v827_v50, 16 }
 0x369   : > { %v833_v52 = vpop.permute.xlu1 %832  ;;  %v830_v53 = vpop.permute.xlu0 %829 }
 0x36a   : > { %949 = vxpose.xlu0.c.b16.start.end [1/1] (short) (narrow) %v833_v52, 16  ;;  %933 = vxpose.xlu1.c.b16.start.end [1/1] (short) (narrow) %v830_v53, 16 }
 0x36d   : > { %v836_v57 = vpop.permute.xlu1 %835  ;;  %v746_v62 = vpop.permute.xlu0 %745 }
 0x36e   : > { %965 = vxpose.xlu0.c.b16.start.end [1/1] (short) (narrow) %v836_v57, 16  ;;  %v751_v3 = vcombine.low %v740_v51, %v746_v62  ;;  %v752_v4 = vcombine.high %v740_v51, %v746_v62 }
 0x370   : > { %v759_v9 = vrot.slane %v751_v3, %v2982_v2  ;;  %v766_v10 = vrot.slane %v752_v4, %v2982_v2 }
 0x371   : > { %v743_v63 = vpop.permute.xlu1 %742 }
 0x375   : > { %v749_v5 = vpop.permute.xlu1 %748 }
 0x376   : > { %v767_v6 = vcombine.low %v743_v63, %v749_v5  ;;  %v768_v7 = vcombine.high %v743_v63, %v749_v5 }
 0x378   : > { %v775_v11 = vrot.slane %v767_v6, %v2982_v2  ;;  %v782_v12 = vrot.slane %v768_v7, %v2982_v2 }
 0x37a   : > { %v783_v13 = vcombine.low %v759_v9, %v775_v11  ;;  %v784_v14 = vcombine.high %v759_v9, %v775_v11  ;;  %v799_v15 = vcombine.low %v766_v10, %v782_v12  ;;  %v800_v17 = vcombine.high %v766_v10, %v782_v12 }
 0x37c   : > { %v791_v18 = vrot.slane %v783_v13, %v2984_v8  ;;  %v798_v19 = vrot.slane %v784_v14, %v2984_v8  ;;  %v807_v20 = vrot.slane %v799_v15, %v2984_v8  ;;  %v814_v21 = vrot.slane %v800_v17, %v2984_v8 }
 0x37e   : > { %v815_v22 = vcombine.high %v791_v18, %v2576_v16  ;;  %v816_v23 = vcombine.high %v798_v19, %v2576_v16  ;;  %v817_v24 = vcombine.high %v807_v20, %v2576_v16  ;;  %v818_v25 = vcombine.high %v814_v21, %v2576_v16 }
 0x37f   : > { %v2028_v26 = vpack.c.bf16 %v807_v20, %v791_v18  ;;  %v2029_v27 = vpack.c.bf16 %v814_v21, %v798_v19  ;;  %v925_v28 = vpop.trf.xlu0 }
 0x380   : > { %v2030_v29 = vpack.c.bf16 %v817_v24, %v815_v22  ;;  %v2031_v30 = vpack.c.bf16 %v818_v25, %v816_v23  ;;  %v987_v31 = vsel %vm985_vm3, %v925_v28, 0 }
 0x381   : > { %v862_v32 = vrot.slane %v2028_v26, %v2982_v2  ;;  %v870_v33 = vrot.slane %v2029_v27, %v2982_v2  ;;  %2093 = vmatpush3.bf16.msra.mxu0 %v987_v31 }
 0x382   : > { %v887_v34 = vrot.slane %v2030_v29, %v2982_v2  ;;  %v895_v35 = vrot.slane %v2031_v30, %v2982_v2  ;;  %2104 = vmatprep.subr.bf16.mxu0 %v2576_v16 }
 0x383   : > { %v871_v36 = vcombine.low %v862_v32, %v870_v33 }
 0x384   : > { %v896_v37 = vcombine.low %v887_v34, %v895_v35 }
 0x385   : > { %v878_v38 = vrot.slane %v871_v36, %v2984_v8 }
 0x386   : > { %v903_v39 = vrot.slane %v896_v37, %v2984_v8 }
 0x387   : > { %v879_v41 = vcombine.high %v878_v38, %v2583_v40  ;;  %v908_v44 = vshrl.u32 %v878_v38, 16 }
 0x388   : > { %v907_v43 = vpack.i.b16 %v903_v39, %v878_v38  ;;  %v909_v45 = vshrl.u32 %v903_v39, 16  ;;  %v904_v46 = vcombine.high %v903_v39, %v2583_v40 }
 0x389   : > { %v914_v49 = vshrl.u32 %v879_v41, 16 }
 0x38a   : > { %2095 = vmatmul.mubr.msk.bf16.vlgmr.msra.gmra.mrb[4].mxu0 %vm981_vm4, %v907_v43  ;;  %v910_v47 = vpack.i.b16 %v909_v45, %v908_v44  ;;  %v913_v48 = vpack.i.b16 %v904_v46, %v879_v41  ;;  %v915_v50 = vshrl.u32 %v904_v46, 16 }
 0x38b   : > { %2106 = vmatprep.mubr.msk.bf16.mxu0 %vm2577_vm1, %v2576_v16 }
 0x38c   : > { %v916_v51 = vpack.i.b16 %v915_v50, %v914_v49 }
 0x3d0   : > { %v941_v52 = vpop.trf.xlu1  ;;  %v957_v53 = vpop.trf.xlu0 }
 0x3d1   : > { %v1033_v54 = vsel %vm985_vm3, %v941_v52, 0  ;;  %v1079_v55 = vsel %vm985_vm3, %v957_v53, 0 }
 0x3d2   : > { %2099 = vmatpush3.bf16.msra.mxu1 %v1033_v54  ;;  %2105 = vmatpush3.bf16.msra.mxu0 %v1079_v55 }
 0x3d3   : > { %2110 = vmatprep.subr.bf16.mxu1 %v2576_v16  ;;  %2116 = vmatprep.subr.bf16.mxu0 %v2576_v16 }
 0x3d4   : > { %v973_v56 = vpop.trf.xlu0 }
 0x3d5   : > { %2101 = vmatmul.mubr.msk.bf16.vlgmr.msra.gmra.mrb[4].mxu1 %vm981_vm4, %v910_v47  ;;  %2107 = vmatmul.mubr.msk.bf16.vlgmr.msra.gmra.mrb[8].mxu0 %vm981_vm4, %v913_v48  ;;  %v1125_v57 = vsel %vm985_vm3, %v973_v56, 0 }
 0x3d6   : > { %2111 = vmatpush3.bf16.msra.mxu1 %v1125_v57  ;;  %2112 = vmatprep.mubr.msk.bf16.mxu1 %vm2577_vm1, %v2576_v16 }
 0x3d7   : > { %2122 = vmatprep.subr.bf16.mxu1 %v2576_v16  ;;  %2118 = vmatprep.mubr.msk.bf16.mxu0 %vm2577_vm1, %v2576_v16 }
 0x3dd   : > { %2113 = vmatmul.mubr.msk.bf16.vlgmr.msra.gmra.mrb[8].mxu1 %vm981_vm4, %v916_v51 }
 0x3de   : > { %2124 = vmatprep.mubr.msk.bf16.mxu1 %vm2577_vm1, %v2576_v16 }
 0x45d   : > { %v1023_v62 = vpop.f32.mrb[4].mxu0 }
 0x45e   : > { %v1024_v63 = vadd.f32 %v1023_v62, %v854_v61  ;;  %v2096_v0 = vpop.f32.mrb[5].mxu0 }
 0x45f   : > { %v1026_v3 = vpop.f32.mrb[6].mxu0 }
 0x460   : > { %v2097_v4 = vpop.f32.mrb[7].mxu0  ;;  %v1167_v5 = vsel %vm981_vm4, %v1024_v63, -inf }
 0x461   : > { %1168 = vmax.xlane.f32.xlu0 %v1167_v5 }
 0x4a8   : > { %v1069_v6 = vpop.f32.mrb[4].mxu1  ;;  %v1115_v7 = vpop.f32.mrb[8].mxu0 }
 0x4a9   : > { %v1070_v9 = vadd.f32 %v1069_v6, %v854_v61  ;;  %v1116_v10 = vadd.f32 %v1115_v7, %v854_v61  ;;  %v2102_v11 = vpop.f32.mrb[5].mxu1  ;;  %v2108_v12 = vpop.f32.mrb[9].mxu0 }
 0x4aa   : > { %v1072_v13 = vpop.f32.mrb[6].mxu1  ;;  %v1118_v14 = vpop.f32.mrb[10].mxu0 }
 0x4ab   : > { %v2103_v15 = vpop.f32.mrb[7].mxu1  ;;  %v2109_v17 = vpop.f32.mrb[11].mxu0  ;;  %v1170_v18 = vsel %vm981_vm4, %v1070_v9, -inf  ;;  %v1173_v19 = vsel %vm981_vm4, %v1116_v10, -inf }
 0x4ac   : > { %1171 = vmax.xlane.f32.xlu1 %v1170_v18  ;;  %1174 = vmax.xlane.f32.xlu0 %v1173_v19 }
 0x4b0   : > { %v1161_v20 = vpop.f32.mrb[8].mxu1 }
 0x4b1   : > { %v1162_v21 = vadd.f32 %v1161_v20, %v854_v61  ;;  %v2114_v22 = vpop.f32.mrb[9].mxu1 }
 0x4b2   : > { %v1164_v23 = vpop.f32.mrb[10].mxu1 }
 0x4b3   : > { %v2115_v24 = vpop.f32.mrb[11].mxu1  ;;  %v1176_v25 = vsel %vm981_vm4, %v1162_v21, -inf }
 0x4b4   : > { %1177 = vmax.xlane.f32.xlu1 %v1176_v25 }
 0x4c2   : > { %637 = vrot.lane.b32.xlu0 %v2972_v42, %s2584_s20  ;;  %s2472_s20 = sshll.u32 %s2588_s24, 4  ;;  %s2473_s20 = int_to_ptr.vmem [resolvable:$false] %s2472_s20 }
 0x4c3   : > { %p2475_p0 = scmp.lt.s32.totalorder %s3095_s4, %s2473_s20 }
 0x4ee   : > { %v1169_v26 = vpop.xlane.xlu0 %1168 }
 0x4ef   : > { %v1179_v35 = vsub.f32 %v1024_v63, %v1169_v26 }
 0x4f1   : > { %v1183_v42 = vmul.f32 1.442695, %v1179_v35 }
 0x539   : > { %v1175_v27 = vpop.xlane.xlu0 %1174  ;;  %v1172_v36 = vpop.xlane.xlu1 %1171 }
 0x53a   : > { %v1181_v28 = vsub.f32 %v1116_v10, %v1175_v27  ;;  %v1180_v37 = vsub.f32 %v1070_v9, %v1172_v36 }
 0x53c   : > { %v1187_v29 = vmul.f32 1.442695, %v1181_v28  ;;  %v1185_v39 = vmul.f32 1.442695, %v1180_v37 }
 0x53d   : > { %v638_v30 = vpop.permute.xlu0 %637 }
 0x53e   : > { %640 = vst.msk [vmem:[#allocation3] sm:$0xf] %vm632_vm2, %v638_v30  ;;  %2280 = vpow2.f32 %v1187_v29 }
 0x53f   : > { %2282 = vpow2.f32 %v1183_v42 }
 0x540   : > { %2284 = vpow2.f32 %v1185_v39 }
 0x541   : > { %v1178_v38 = vpop.xlane.xlu1 %1177 }
 0x542   : > { %v1182_v40 = vsub.f32 %v1162_v21, %v1178_v38 }
 0x544   : > { %v1189_v41 = vmul.f32 1.442695, %v1182_v40 }
 0x545   : > { %v838_v31 = vld [vmem:[#allocation3] sm:$0xf] }
 0x546   : > { %840 = vrot.lane.b32.xlu1 %v838_v31, %s2578_s9  ;;  %2286 = vpow2.f32 %v1189_v41 }
 0x548   : > { %v2281_v32 = vpop.eup %2280 }
 0x549   : > { %v1193_v33 = vmul.f32 %v2281_v32, %v3028_v59  ;;  %v2283_v43 = vpop.eup %2282 }
 0x54a   : > { %v1191_v44 = vmul.f32 %v2283_v43, %v3028_v59  ;;  %v2285_v45 = vpop.eup %2284 }
 0x54b   : > { %v1201_v34 = vsel %vm981_vm4, %v1193_v33, 0.0  ;;  %v1192_v47 = vmul.f32 %v2285_v45, %v3028_v59 }
 0x54c   : > { %1202 = vadd.xlane.f32.xlu0 %v1201_v34  ;;  %v1195_v46 = vsel %vm981_vm4, %v1191_v44, 0.0 }
 0x54d   : > { %v1198_v49 = vsel %vm981_vm4, %v1192_v47, 0.0 }
 0x550   : > { %v2287_v48 = vpop.eup %2286 }
 0x551   : > { %v1194_v50 = vmul.f32 %v2287_v48, %v3028_v59 }
 0x553   : > { %v1204_v51 = vsel %vm981_vm4, %v1194_v50, 0.0 }
 0x562   : > { %843 = vrot.lane.b32.xlu0 %v838_v31, %s2579_s3 }
 0x56a   : > { %1196 = vadd.xlane.f32.xlu1 %v1195_v46 }
 0x56e   : > { %1199 = vadd.xlane.f32.xlu1 %v1198_v49 }
 0x572   : > { %1205 = vadd.xlane.f32.xlu1 %v1204_v51 }
 0x580   : > { %1223 = vxpose.xlu0.c.b16.start.end [1/1] (short) (narrow) %v838_v31, 16 }
 0x583   : > { %846 = vrot.lane.b32.xlu1 %v838_v31, %s2580_s11  ;;  %s3196_s11 = sld [smem:[#allocation31_spill]] }
 0x589   : > { %s3093_s25 = scalar_lea.hbm %s3196_s11, %s2047_s14 }
 0x5b8   : > { %v841_v52 = vpop.permute.xlu1 %840 }
 0x5b9   : > { %1239 = vxpose.xlu1.c.b16.start.end [1/1] (short) (narrow) %v841_v52, 16 }
 0x5d9   : > { %v1203_v53 = vpop.xlane.xlu0 %1202 }
 0x5da   : > { %v1209_v56 = vmax.f32 %v1203_v53, 1e-09 }
 0x5dd   : > { %v844_v54 = vpop.permute.xlu0 %843 }
 0x5de   : > { %1255 = vxpose.xlu0.c.b16.start.end [1/1] (short) (narrow) %v844_v54, 16 }
 0x5e6   : > { %v1231_v13 = vpop.trf.xlu0 }
 0x5f7   : > { %v1197_v55 = vpop.xlane.xlu1 %1196 }
 0x5f8   : > { %v1207_v57 = vmax.f32 %v1197_v55, 1e-09  ;;  %v2274_v55 = vld [vmem:[#allocation13] sm:$0xff]  }
 0x5fa   : > { %2288 = vrcp.f32 %v1207_v57 }
 0x5fb   : > { %v1200_v58 = vpop.xlane.xlu1 %1199  ;;  %2290 = vrcp.f32 %v1209_v56 }
 0x5fc   : > { %v1208_v60 = vmax.f32 %v1200_v58, 1e-09 }
 0x5fe   : > { %2292 = vrcp.f32 %v1208_v60 }
 0x5ff   : > { %v1206_v59 = vpop.xlane.xlu1 %1205 }
 0x600   : > { %v1210_v3 = vmax.f32 %v1206_v59, 1e-09 }
 0x602   : > { %2294 = vrcp.f32 %v1210_v3 }
 0x603   : > { %v847_v61 = vpop.permute.xlu1 %846 }
 0x604   : > { %v2289_v62 = vpop.eup %2288  ;;  %1271 = vxpose.xlu0.c.b16.start.end [1/1] (short) (narrow) %v847_v61, 16 }
 0x605   : > { %v1215_v63 = vmul.f32 %v2289_v62, %v1191_v44  ;;  %v2291_v0 = vpop.eup %2290 }
 0x606   : > { %v1217_v9 = vmul.f32 %v2291_v0, %v1193_v33  ;;  %v2275_v0 = vld [vmem:[#allocation13 + $0x8] sm:$0xff]  }
 0x607   : > { %v1219_v4 = vpack.c.bf16 %v1215_v63, %v1215_v63 }
 0x608   : > { %v2293_v5 = vpop.eup %2292  ;;  %v1221_v12 = vpack.c.bf16 %v1217_v9, %v1217_v9 }
 0x609   : > { %v1291_v6 = vsel %vm981_vm4, %v1219_v4, 0  ;;  %v1216_v7 = vmul.f32 %v2293_v5, %v1192_v47 }
 0x60a   : > { %2117 = vmatpush3.bf16.xpose.msra.mxu0 %v1291_v6  ;;  %v1383_v14 = vsel %vm981_vm4, %v1221_v12, 0 }
 0x60b   : > { %v1220_v10 = vpack.c.bf16 %v1216_v7, %v1216_v7  ;;  %2128 = vmatprep.subr.bf16.mxu0 %v2576_v16 }
 0x60c   : > { %v2295_v15 = vpop.eup %2294 }
 0x60d   : > { %v1337_v11 = vsel %vm981_vm4, %v1220_v10, 0  ;;  %v1218_v17 = vmul.f32 %v2295_v15, %v1194_v50 }
 0x60e   : > { %2123 = vmatpush3.bf16.xpose.msra.mxu1 %v1337_v11 }
 0x60f   : > { %2134 = vmatprep.subr.bf16.mxu1 %v2576_v16  ;;  %v1222_v18 = vpack.c.bf16 %v1218_v17, %v1218_v17 }
 0x611   : > { %2119 = vmatmul.mubr.msk.bf16.vlgmr.msra.gmra.mrb[12].mxu0 %vm981_vm4, %v1231_v13  ;;  %v1429_v20 = vsel %vm981_vm4, %v1222_v18, 0 }
 0x612   : > { %2129 = vmatpush3.bf16.xpose.msra.mxu0 %v1383_v14  ;;  %2130 = vmatprep.mubr.msk.bf16.mxu0 %vm2577_vm1, %v2576_v16 }
 0x613   : > { %2140 = vmatprep.subr.bf16.mxu0 %v2576_v16 }
 0x61f   : > { %v1247_v19 = vpop.trf.xlu1 }
 0x620   : > { %2125 = vmatmul.mubr.msk.bf16.vlgmr.msra.gmra.mrb[12].mxu1 %vm981_vm4, %v1247_v19 }
 0x621   : > { %2135 = vmatpush3.bf16.xpose.msra.mxu1 %v1429_v20  ;;  %2136 = vmatprep.mubr.msk.bf16.mxu1 %vm2577_vm1, %v2576_v16 }
 0x644   : > { %v1263_v21 = vpop.trf.xlu0 }
 0x645   : > { %2131 = vmatmul.mubr.msk.bf16.vlgmr.msra.gmra.mrb[16].mxu0 %vm981_vm4, %v1263_v21 }
 0x646   : > { %2144 = vmatprep.mubr.msk.bf16.mxu0 %vm2577_vm1, %v2576_v16  ;;  %2141 = vmatpush3.bf16.msra.mxu0 %v2274_v55 }
 0x647   : > { %2142 = vmatprep.subr.bf16.mxu0 %v2576_v16 }
 0x64a   : > { %2143 = vmatpush3.bf16.msra.mxu0 %v2275_v0 }
 0x66a   : > { %v1279_v22 = vpop.trf.xlu0 }
 0x66b   : > { %2137 = vmatmul.mubr.msk.bf16.vlgmr.msra.gmra.mrb[16].mxu1 %vm981_vm4, %v1279_v22 }
 0x6e4   : > { %v1327_v23 = vpop.f32.mrb[12].mxu0 }
 0x6e5   : > { %v2120_v24 = vpop.f32.mrb[13].mxu0  ;;  %1471 = vxpose.xlu0.b32.start.end [1/1] (short) (narrow) %v1327_v23, 8 }
 0x6e6   : > { %v1330_v25 = vpop.f32.mrb[14].mxu0 }
 0x6e7   : > { %v2121_v26 = vpop.f32.mrb[15].mxu0  ;;  %v2042_v25 = vld [vmem:[%s3195_s26] ss:$0 sm:$0xff] }
 0x6f3   : > { %v1373_v27 = vpop.f32.mrb[12].mxu1 }
 0x6f4   : > { %v2126_v28 = vpop.f32.mrb[13].mxu1  ;;  %1503 = vxpose.xlu1.b32.start.end [1/1] (short) (narrow) %v1373_v27, 8 }
 0x6f5   : > { %v1376_v29 = vpop.f32.mrb[14].mxu1 }
 0x6f6   : > { %v2127_v30 = vpop.f32.mrb[15].mxu1 }
 0x718   : > { %v1419_v31 = vpop.f32.mrb[16].mxu0 }
 0x719   : > { %1535 = vxpose.xlu0.b32.start.end [1/1] (short) (narrow) %v1419_v31, 8  ;;  %v2132_v32 = vpop.f32.mrb[17].mxu0 }
 0x71a   : > { %v1422_v33 = vpop.f32.mrb[18].mxu0 }
 0x71b   : > { %v2133_v34 = vpop.f32.mrb[19].mxu0 }
 0x73e   : > { %v1465_v35 = vpop.f32.mrb[16].mxu1 }
 0x73f   : > { %1567 = vxpose.xlu0.b32.start.end [1/1] (short) (narrow) %v1465_v35, 8  ;;  %v2138_v36 = vpop.f32.mrb[17].mxu1 }
 0x740   : > { %v1468_v42 = vpop.f32.mrb[18].mxu1 }
 0x741   : > { %v2139_v37 = vpop.f32.mrb[19].mxu1 }
 0x765   : > { %v1487_v38 = vpop.trf.xlu0 }
 0x774   : > { %v1519_v40 = vpop.trf.xlu1 }
 0x799   : > { %v1551_v39 = vpop.trf.xlu0 }
 0x79a   : > { %v1599_v41 = vcombine.low %v1487_v38, %v1551_v39  ;;  %v1600_v43 = vcombine.high %v1487_v38, %v1551_v39 }
 0x79c   : > { %v1607_v47 = vrot.slane %v1599_v41, %v2982_v2  ;;  %v1614_v48 = vrot.slane %v1600_v43, %v2982_v2 }
 0x7bf   : > { %v1583_v44 = vpop.trf.xlu0 }
 0x7c0   : > { %v1615_v45 = vcombine.low %v1519_v40, %v1583_v44  ;;  %v1616_v46 = vcombine.high %v1519_v40, %v1583_v44 }
 0x7c2   : > { %v1623_v49 = vrot.slane %v1615_v45, %v2982_v2  ;;  %v1630_v50 = vrot.slane %v1616_v46, %v2982_v2 }
 0x7c4   : > { %v1631_v51 = vcombine.low %v1607_v47, %v1623_v49  ;;  %v1632_v52 = vcombine.high %v1607_v47, %v1623_v49  ;;  %v1647_v53 = vcombine.low %v1614_v48, %v1630_v50  ;;  %v1648_v54 = vcombine.high %v1614_v48, %v1630_v50 }
 0x7c6   : > { %v1639_v56 = vrot.slane %v1631_v51, %v2984_v8  ;;  %v1646_v57 = vrot.slane %v1632_v52, %v2984_v8  ;;  %v1655_v58 = vrot.slane %v1647_v53, %v2984_v8  ;;  %v1662_v60 = vrot.slane %v1648_v54, %v2984_v8 }
 0x7c8   : > { %v1667_v59 = vcombine.low %v1639_v56, %v1646_v57  ;;  %v2040_v61 = vcombine.high %v1639_v56, %v1646_v57  ;;  %v1683_v62 = vcombine.low %v1655_v58, %v1662_v60  ;;  %v2041_v63 = vcombine.high %v1655_v58, %v1662_v60 }
 0x7ca   : > { %v1674_v3 = vrot.slane %v1667_v59, %v2982_v2  ;;  %v1682_v4 = vrot.slane %v2040_v61, %v2982_v2  ;;  %v1690_v5 = vrot.slane %v1683_v62, %v2982_v2  ;;  %v1698_v6 = vrot.slane %v2041_v63, %v2982_v2 }
 0x7cc   : > { %v1700_v7 = vcombine.high %v1674_v3, %v1682_v4  ;;  %v1716_v9 = vcombine.high %v1690_v5, %v1698_v6  ;;  %v1699_v10 = vcombine.low %v1674_v3, %v1682_v4  ;;  %v1715_v11 = vcombine.low %v1690_v5, %v1698_v6 }
 0x7ce   : > { %v1714_v16 = vrot.slane %v1700_v7, %v2984_v8  ;;  %v1730_v12 = vrot.slane %v1716_v9, %v2984_v8  ;;  %v1707_v13 = vrot.slane %v1699_v10, %v2984_v8  ;;  %v1723_v14 = vrot.slane %v1715_v11, %v2984_v8 }
 0x7d0   : > { %v1733_v15 = vcombine.low %v1714_v16, %v1730_v12  ;;  %v1732_v17 = vcombine.high %v1707_v13, %v1723_v14  ;;  %v1731_v18 = vcombine.low %v1707_v13, %v1723_v14  ;;  %v1734_v2 = vcombine.high %v1714_v16, %v1730_v12 }
 0x7d2   : > { %1740 = vrot.lane.b32.xlu0 %v1733_v15, %s2585_s12  ;;  %1736 = vrot.lane.b32.xlu1 %v1732_v17, %s2586_s23  ;;  %s2474_s12 = scalar_lea.vmem %s2473_s20, 256 }
 0x7d3   : > { %p2476_p7 = scmp.lt.s32.totalorder %s2474_s12, %s2468_s10 }
 0x7d5   : > { %p2477_p3 = por %p2476_p7, %p2475_p0 }
 0x7d6   : > { %1744 = vrot.lane.b32.xlu1 %v1734_v2, %s2587_s27 }
 0x7d7   : > { %p2478_p2 = pnand %p2477_p3, %p2471_p9 }
 0x844   : > { %v1737_v19 = vpop.permute.xlu1 %1736  ;;  %v1741_v20 = vpop.permute.xlu0 %1740 }
 0x845   : > { %v1747_v21 = vsel %vm981_vm4, %v1731_v18, %v1737_v19 }
 0x846   : > { %v1749_v8 = vsel %vm1748_vm6, %v1747_v21, %v1741_v20 }
 0x848   : > { %v1745_v22 = vpop.permute.xlu1 %1744 }
 0x849   : > { %v1751_v23 = vsel %vm1750_vm7, %v1749_v8, %v1745_v22 }
 0x84a   : > { %v1752_v24 = vpack.c.bf16 %v1751_v23, %v1751_v23 }
 0x84c   : > { %2145 = vmatmul.mubr.msk.bf16.vlgmr.msra.gmra.mrb[20].mxu0 %vm535_vm0, %v1752_v24 }
 0x91f   : > { %v1813_v26 = vpop.f32.mrb[20].mxu0 }
 0x920   : > { %v1814_v27 = vadd.f32 %v2042_v25, %v1813_v26  ;;  %v2146_v28 = vpop.f32.mrb[21].mxu0 }
 0x921   : > { %v1816_v29 = vpop.f32.mrb[22].mxu0 }
 0x922   : > { %v1819_v30 = vadd.f32 %v1814_v27, %v2936_v1  ;;  %v2147_v31 = vpop.f32.mrb[23].mxu0 }
 0x924   : > { %1820 = vst.msk [vmem:[%s522_s8] sm:$0xff] %vm535_vm0, %v1819_v30 }
 0x925   : > { %2481 = shalt.err (!%p2478_p2)
}
 0x926   : > { %s2482_s5 = scalar_lea.hbm %s3093_s25, 128  ;;  %s2486_s27 = scalar_lea.hbm %s3196_s11, 256 }
 0x927   : > { %p2483_p10 = scmp.ne.s32.totalorder %s3093_s25, %s2482_s5  ;;  %p2487_p8 = scmp.lt.u32.totalorder %s3093_s25, %s3196_s11 }
 0x928   : > { %p2488_p1 = scmp.lt.u32.totalorder %s2486_s27, %s2482_s5  ;;  %p2490_p6 = scmp.lt.u32.totalorder %s2482_s5, %s3093_s25 }
 0x929   : > { %p2484_p11 = pnand %p2483_p10, %p3197_p13 }
 0x92a   : > { %p2489_p12 = por %p2488_p1, %p2487_p8 }
 0x92b   : > { %p2485_p5 = pneg %p2484_p11 }
 0x92c   : > { %p2491_p4 = por %p2490_p6, %p2489_p12 }
 0x92e   : > { %p2492_p9 = pnand %p2491_p4, %p2485_p5 }
 0x930   : > { %2495 = shalt.err (!%p2492_p9)
}
 0x931   : > { %2168 = dma.vmem_to_hbm [thread:$0]  (%p3197_p13), %s3095_s4, 128, %s3093_s25, %s1822_s7  }
 0x932 PF: > { %s1848_s26 = sand.u32 1, %s2546_s17   ;;  %p3198_p0 = scmp.ne.s32.totalorder %s3182_s30, 0 }
 0x933   : > { %p3199_p7 = scmp.ge.s32.totalorder %s2566_s22, 2  ;;  %s1849_s14 = scalar_lea.sflag [#allocation6], %s1848_s26 }
 0x935   : > { %p2191_p3 = pnand %p3199_p7, %p3198_p0 }
 0x937   : > { %2541 = dma.done.wait (!%p2191_p3), %s1849_s14, 128  }
 0x938   : > { %2543 = vsyncadd (!%p2191_p3), %s1849_s14, 4294967168  ;;  %s32_s22 = sadd.s32 1, %s2566_s22   ;;  %s3200_s16 = sld [smem:[#allocation23_spill]] }
 0x939   : > { %p29_p2 = scmp.ge.s32.totalorder %s32_s22, 4   ;;  %s3201_s17 = smov %s2550_s18 }
 0x93a   : > { %s3202_s18 = smov %s2554_s19  ;;  %s3203_s19 = smov %s2828_s28 }
 0x93b   : > { %s3204_s20 = smov %s2562_s21  ;;  %31 = sbr.rel (!%p29_p2) target bundleno = 19 (0x13), region = 145 }
 0x93e   : > { %s3205_s21 = smov %s3200_s16 }
 0x942   :  { %1854 = vsyncpa [#allocation5], 1 }
 0x943   :  { %1856 = vsyncpa [#allocation5 + $0x1], 1 }
 0x944   :  { %1857 = vsyncpa [#allocation8], 1 }
 0x945   :  { %1859 = vsyncpa [#allocation8 + $0x1], 1 }
 0x946   :  { %1860 = vsyncpa [#allocation11], 1 }
 0x947   :  { %1861 = vsyncpa [#allocation14], 1 }
 0x948   :  { %1862 = vsyncpa [#allocation6], 1 }
 0x949   :  { %1864 = vsyncpa [#allocation6 + $0x1], 1 }

</bundles_post_ra>
